<compile_context>
chip_gen: v7x
topology: tpu7x:2x2x1
jax: 0.10.0
libtpu: 0.0.40
codegen_flags: <defaults>
</compile_context>

<pallas_src>
import functools
import math

import jax
import jax.numpy as jnp
from jax.experimental import pallas as pl
from jax.experimental.pallas import tpu as pltpu

_LN_EPS = 1e-5  # nn.LayerNorm default eps


# ---------------------------------------------------------------------------
# math helpers (pure jnp — used inside the kernels and in the references)
# ---------------------------------------------------------------------------
def _layer_norm(v, w, b):
    mu = jnp.mean(v, axis=-1, keepdims=True)
    var = jnp.mean((v - mu) ** 2, axis=-1, keepdims=True)
    return (v - mu) * jax.lax.rsqrt(var + _LN_EPS) * w + b


def _gelu_tanh(x):
    # tanh-approximate GELU: the tanh goes to the EUP (free slot), ~3x fewer
    # VALU ops than the erf polynomial.  |err| vs exact GELU < ~1e-3.  [rev#8]
    c = math.sqrt(2.0 / math.pi)
    return 0.5 * x * (1.0 + jnp.tanh(c * (x + 0.044715 * x * x * x)))


def _gelu_exact(x):
    # exact erf GELU (reference only, runs outside the kernels).
    return 0.5 * x * (1.0 + jax.lax.erf(x * (1.0 / math.sqrt(2.0))))


def _linear_kmajor(x2d, wT, b):
    # x:(N,in) (cast to bf16 by caller or here), wT:(in,out) bf16 (pre-
    # transposed in the wrapper, K-major RHS for the MXU), f32 accumulation.
    y = jax.lax.dot_general(x2d.astype(jnp.bfloat16), wT,
                            (((1,), (0,)), ((), ())),
                            preferred_element_type=jnp.float32)
    return y + b


# ---------------------------------------------------------------------------
# VMEM footprint model + generation-aware tile choosers         [rev#4,#5,#7]
# ---------------------------------------------------------------------------
def _vmem_capacity_bytes():
    try:
        return int(pltpu.get_tpu_info().vmem_capacity_bytes)   # 64 MiB v7x, 128 MiB v5e/v6e
    except Exception:
        return 64 << 20    # conservative fallback valid on every generation


def _vmem_ceiling():
    # ~48 MiB on v7x, ~96 MiB on v5e/v6e.
    return int(0.75 * _vmem_capacity_bytes())


def _bytes(shape, dtype):
    """Padded VMEM footprint of one buffer ((8,128) tiling of last two dims)."""
    s = list(shape)
    s[-1] = -(-s[-1] // 128) * 128
    if len(s) >= 2:
        s[-2] = -(-s[-2] // 8) * 8
    return math.prod(s) * jnp.dtype(dtype).itemsize


def _vmem_need(entries):
    """entries: list of (shape, dtype, buffer_count) — pipelined block buffers,
    resident weights and the dominant in-kernel f32 intermediates."""
    total = sum(_bytes(s, d) * n for s, d, n in entries)
    return int(1.25 * total) + (2 << 20)          # relayout / compiler scratch slack


def _vmem_limit(entries):
    return max(min(_vmem_need(entries), _vmem_ceiling()), 4 << 20)


def _k1_footprint(tn, E):
    return [
        ((tn, E), jnp.float32, 2),          # x block (double buffered)
        ((tn, E), jnp.float32, 2),          # pos block
        ((1, E), jnp.float32, 4),           # n1w, n1b
        ((E, 2 * E), jnp.bfloat16, 2),      # wqkT (resident)
        ((1, 2 * E), jnp.float32, 2),       # bqk
        ((E, E), jnp.bfloat16, 2),          # wvT (resident)
        ((1, E), jnp.float32, 2),           # bv
        ((tn, E), jnp.bfloat16, 6),         # q, k, v outputs (2 bufs each)
        ((tn, 2 * E), jnp.float32, 1),      # fused qk f32 intermediate
        ((tn, E), jnp.float32, 3),          # x2 / qk_in / v f32 intermediates
    ]


def _k2_footprint(th, S, hd, E):
    return [
        ((S, 1, 1, E), jnp.float32, 2),     # residual x block
        ((1, th, S, hd), jnp.bfloat16, 6),  # q, k, v blocks (2 bufs each)
        ((th, hd, E), jnp.bfloat16, 2),     # Wo head slice
        ((1, E), jnp.float32, 2),           # bo
        ((S, 1, 1, E), jnp.float32, 2),     # output block
        ((th, S, S), jnp.float32, 2),       # in-kernel f32 scores s and p
        ((th, S, hd), jnp.float32, 1),      # o accumulator
        ((S, E), jnp.float32, 2),           # per-head Wo partial + running sum
    ]


def _k3_footprint(tn, E, M):
    return [
        ((tn, E), jnp.float32, 2),          # x+attn input block
        ((1, E), jnp.float32, 4),           # n2w, n2b
        ((E, M), jnp.bfloat16, 2),          # w1T (resident)
        ((1, M), jnp.float32, 2),           # b1
        ((M, E), jnp.bfloat16, 2),          # w2T (resident)
        ((1, E), jnp.float32, 2),           # b2
        ((tn, E), jnp.float32, 2),          # output block
        ((tn, M), jnp.float32, 2),          # GELU hidden (pre/post)
        ((tn, E), jnp.float32, 2),          # x2 / h2 intermediates
    ]


def _choose_token_tile(N, footprint_fn, cap=512):
    """Largest multiple-of-8 divisor of N <= cap whose VMEM footprint fits the
    generation ceiling, preferring >=2 grid steps (v7x megacore)."""
    ceil = _vmem_ceiling()
    cands = [t for t in range(8, min(cap, N) + 1, 8) if N % t == 0]
    if not cands:
        # TODO(synk): no 8-aligned divisor -> single full block (no remainder masking).
        return N
    pref = [t for t in cands if N // t >= 2] or cands
    for t in sorted(pref, reverse=True):
        if _vmem_need(footprint_fn(t)) <= ceil:
            return t
    return min(pref)


def _choose_head_tile(H, S, hd, E):
    """Largest divisor of H whose kernel-2 footprint (incl. (th,S,S) f32
    scores) fits the generation VMEM ceiling."""
    ceil = _vmem_ceiling()
    for th in sorted((d for d in range(1, H + 1) if H % d == 0), reverse=True):
        if _vmem_need(_k2_footprint(th, S, hd, E)) <= ceil:
            return th
    return 1   # TODO(synk): flash-style kv tiling once one head's scores overflow VMEM


# ---------------------------------------------------------------------------
# Kernel 1: LayerNorm1 + pos add + fused Q|K projection + V projection
#   token-tiled 'parallel' grid; weights resident (constant index_map);
#   Q and K written to two separate outputs (lane split on store).   [rev#1]
# ---------------------------------------------------------------------------
def _proj_kernel(x_ref, pos_ref, n1w_ref, n1b_ref,
                 wqkt_ref, bqk_ref, wvt_ref, bv_ref,
                 q_out_ref, k_out_ref, v_out_ref):
    x = x_ref[...]                                            # (tn, E) f32
    x2 = _layer_norm(x, n1w_ref[...], n1b_ref[...])           # f32 LN stats
    qk_in = x2 + pos_ref[...]                                 # q = k = x2 + pos
    qk = _linear_kmajor(qk_in, wqkt_ref[...], bqk_ref[...])   # (tn, 2E) f32; scale folded
    v = _linear_kmajor(x2, wvt_ref[...], bv_ref[...])         # (tn, E)  f32
    E = x.shape[-1]
    q_out_ref[...] = qk[:, :E].astype(jnp.bfloat16)           # separate stores -> no
    k_out_ref[...] = qk[:, E:].astype(jnp.bfloat16)           #   XLA slab slicing
    v_out_ref[...] = v.astype(jnp.bfloat16)


# ---------------------------------------------------------------------------
# Kernel 2: attention core + folded Wo projection + bias + first residual
#   grid = (batch 'parallel', head-tile 'arbitrary'); output block is the
#   lane-dense (S,1,1,E) f32 slab for batch b, accumulated across head tiles.
# ---------------------------------------------------------------------------
def _attn_kernel(x_ref, q_ref, k_ref, v_ref, woh_ref, bo_ref, out_ref):
    j = pl.program_id(1)
    q = q_ref[0]                                              # (th, S, hd) bf16 (scale folded)
    k = k_ref[0]
    v = v_ref[0]
    s = jnp.einsum("hsd,htd->hst", q, k,
                   preferred_element_type=jnp.float32)        # (th, S, S) f32
    m = jnp.max(s, axis=-1, keepdims=True)
    p = jnp.exp(s - m)
    denom = jnp.sum(p, axis=-1, keepdims=True)
    o = jnp.einsum("hst,htd->hsd", p.astype(jnp.bfloat16), v,
                   preferred_element_type=jnp.float32)        # (th, S, hd) f32
    # post-PV normalization on S*hd elements (EUP approx reciprocal)  [rev#3]
    o = o * pl.reciprocal(denom, approx=True)
    ob = o.astype(jnp.bfloat16)

    # Folded Wo out-projection: per-head (S,hd)x(hd,E) MXU accumulation — no
    # in-kernel (th,S,hd)->(S,th*hd) relayout; the extra MXU passes hide under
    # the VPU/EUP-bound softmax work.                                  [rev#10a]
    partial = None
    for h in range(ob.shape[0]):                              # static head loop
        c = jax.lax.dot_general(ob[h], woh_ref[h],
                                (((1,), (0,)), ((), ())),
                                preferred_element_type=jnp.float32)   # (S, E)
        partial = c if partial is None else partial + c

    @pl.when(j == 0)
    def _():
        # initialize with the residual input and the out-proj bias
        out_ref[:, 0, 0, :] = x_ref[:, 0, 0, :] + bo_ref[...]

    out_ref[:, 0, 0, :] += partial                            # accumulate across head tiles


# ---------------------------------------------------------------------------
# Kernel 3: LayerNorm2 + GELU(tanh) MLP + residual
#   token-tiled 'parallel' grid; (E,M)/(M,E) weights resident.
# ---------------------------------------------------------------------------
def _mlp_kernel(x_ref, n2w_ref, n2b_ref, w1t_ref, b1_ref, w2t_ref, b2_ref,
                out_ref):
    x = x_ref[...]                                            # (tn, E) f32 = x + attn_out
    x2 = _layer_norm(x, n2w_ref[...], n2b_ref[...])
    h1 = _gelu_tanh(_linear_kmajor(x2, w1t_ref[...], b1_ref[...]))   # (tn, M) f32
    h2 = _linear_kmajor(h1, w2t_ref[...], b2_ref[...])                # (tn, E) f32
    out_ref[...] = x + h2                                     # dropout/dropout2 = identity


# ---------------------------------------------------------------------------
# wrapper
# ---------------------------------------------------------------------------
def attention_layer(x, params, pos_emb=None, *, nhead=8):
    S, B, E = x.shape
    H = nhead
    assert E % H == 0, "embed_dim must be divisible by nhead"
    hd = E // H
    N = S * B
    M = params["w1"].shape[0]
    bf16 = jnp.bfloat16

    if pos_emb is None:
        pos_emb = jnp.zeros_like(x)

    x2d = x.reshape(N, E).astype(jnp.float32)
    pos2d = pos_emb.reshape(N, E).astype(jnp.float32)

    # Pre-transposed (K-major) bf16 weights, cast once here.           [rev#9]
    # Scale fold: q = (x2+pos) @ (scale*Wq)^T + scale*bq.              [rev#2]
    scale = 1.0 / math.sqrt(hd)
    wqkT = jnp.concatenate([(params["wq"] * scale).T, params["wk"].T],
                           axis=1).astype(bf16)               # (E, 2E)
    bqk = jnp.concatenate([params["bq"] * scale, params["bk"]],
                          axis=1).astype(jnp.float32)         # (1, 2E)
    wvT = params["wv"].T.astype(bf16)                         # (E, E)
    woh = params["wo"].T.reshape(H, hd, E).astype(bf16)       # per-head Wo^T slices
    bo = params["bo"].astype(jnp.float32)                     # (1, E)
    w1T = params["w1"].T.astype(bf16)                         # (E, M)
    w2T = params["w2"].T.astype(bf16)                         # (M, E)

    # ---- kernel 1: LN1 + pos + fused QK / V projections -------------------
    tn1 = _choose_token_tile(N, lambda t: _k1_footprint(t, E))
    q2d, k2d, v2d = pl.pallas_call(
        _proj_kernel,
        grid=(N // tn1,),
        in_specs=[
            pl.BlockSpec((tn1, E), lambda i: (i, 0)),         # x
            pl.BlockSpec((tn1, E), lambda i: (i, 0)),         # pos
            pl.BlockSpec((1, E), lambda i: (0, 0)),           # n1w
            pl.BlockSpec((1, E), lambda i: (0, 0)),           # n1b
            pl.BlockSpec((E, 2 * E), lambda i: (0, 0)),       # wqkT (resident)
            pl.BlockSpec((1, 2 * E), lambda i: (0, 0)),       # bqk
            pl.BlockSpec((E, E), lambda i: (0, 0)),           # wvT (resident)
            pl.BlockSpec((1, E), lambda i: (0, 0)),           # bv
        ],
        out_specs=(
            pl.BlockSpec((tn1, E), lambda i: (i, 0)),
            pl.BlockSpec((tn1, E), lambda i: (i, 0)),
            pl.BlockSpec((tn1, E), lambda i: (i, 0)),
        ),
        out_shape=(
            jax.ShapeDtypeStruct((N, E), bf16),
            jax.ShapeDtypeStruct((N, E), bf16),
            jax.ShapeDtypeStruct((N, E), bf16),
        ),
        compiler_params=pltpu.CompilerParams(
            dimension_semantics=("parallel",),
            vmem_limit_bytes=_vmem_limit(_k1_footprint(tn1, E))),
    )(x2d, pos2d, params["n1w"], params["n1b"], wqkT, bqk, wvT, params["bv"])

    # Remaining layout plumbing: bf16 head-split transposes in XLA.
    # TODO(synk): move these in-kernel (pltpu.einshape "shd->hsd") to remove
    # the last three layout HBM passes.
    def to_heads(t2d):
        return t2d.reshape(S, B, H, hd).transpose(1, 2, 0, 3)  # (B, H, S, hd)

    qh, kh, vh = to_heads(q2d), to_heads(k2d), to_heads(v2d)

    # ---- kernel 2: attention + Wo + bias + first residual ------------------
    x4 = x2d.reshape(S, B, 1, E)                               # free metadata reshape
    th = _choose_head_tile(H, S, hd, E)
    xattn4 = pl.pallas_call(
        _attn_kernel,
        grid=(B, H // th),                                     # batch parallel, heads arbitrary
        in_specs=[
            pl.BlockSpec((S, 1, 1, E), lambda b, j: (0, b, 0, 0)),     # residual x
            pl.BlockSpec((1, th, S, hd), lambda b, j: (b, j, 0, 0)),   # q
            pl.BlockSpec((1, th, S, hd), lambda b, j: (b, j, 0, 0)),   # k
            pl.BlockSpec((1, th, S, hd), lambda b, j: (b, j, 0, 0)),   # v
            pl.BlockSpec((th, hd, E), lambda b, j: (j, 0, 0)),         # Wo head slice
            pl.BlockSpec((1, E), lambda b, j: (0, 0)),                 # bo
        ],
        out_specs=pl.BlockSpec((S, 1, 1, E), lambda b, j: (0, b, 0, 0)),
        out_shape=jax.ShapeDtypeStruct((S, B, 1, E), jnp.float32),
        compiler_params=pltpu.CompilerParams(
            dimension_semantics=("parallel", "arbitrary"),
            vmem_limit_bytes=_vmem_limit(_k2_footprint(th, S, hd, E))),
    )(x4, qh, kh, vh, woh, bo)

    xattn2d = xattn4.reshape(N, E)                             # free: already token-ordered

    # ---- kernel 3: LN2 + GELU MLP + residual -------------------------------
    tn3 = _choose_token_tile(N, lambda t: _k3_footprint(t, E, M))
    out2d = pl.pallas_call(
        _mlp_kernel,
        grid=(N // tn3,),
        in_specs=[
            pl.BlockSpec((tn3, E), lambda i: (i, 0)),          # x + attn_out
            pl.BlockSpec((1, E), lambda i: (0, 0)),            # n2w
            pl.BlockSpec((1, E), lambda i: (0, 0)),            # n2b
            pl.BlockSpec((E, M), lambda i: (0, 0)),            # w1T (resident)
            pl.BlockSpec((1, M), lambda i: (0, 0)),            # b1
            pl.BlockSpec((M, E), lambda i: (0, 0)),            # w2T (resident)
            pl.BlockSpec((1, E), lambda i: (0, 0)),            # b2
        ],
        out_specs=pl.BlockSpec((tn3, E), lambda i: (i, 0)),
        out_shape=jax.ShapeDtypeStruct((N, E), jnp.float32),
        compiler_params=pltpu.CompilerParams(
            dimension_semantics=("parallel",),
            vmem_limit_bytes=_vmem_limit(_k3_footprint(tn3, E, M))),
    )(xattn2d, params["n2w"], params["n2b"], w1T, params["b1"], w2T, params["b2"])

    return out2d.reshape(S, B, E)


# ---------------------------------------------------------------------------
# pure-JAX references.
#   mxu_bf16=True mirrors the kernel math (bf16 MXU operands, f32 accumulation,
#   scale folded into Wq, p cast to bf16 before the PV matmul, post-PV
#   normalization, tanh GELU); mxu_bf16=False is the exact f32 (PyTorch) path.
# ---------------------------------------------------------------------------
def attention_layer_ref(x, params, pos_emb=None, *, nhead=8, mxu_bf16=True):
    S, B, E = x.shape
    H = nhead
    hd = E // H
    scale = 1.0 / math.sqrt(hd)
    if pos_emb is None:
        pos_emb = jnp.zeros_like(x)
    cast = (lambda t: t.astype(jnp.bfloat16)) if mxu_bf16 else (lambda t: t)
    gelu = _gelu_tanh if mxu_bf16 else _gelu_exact

    def linear(v2d, w, b):                                    # w: (out, in)
        y = jax.lax.dot_general(cast(v2d), cast(w), (((1,), (1,)), ((), ())),
                                preferred_element_type=jnp.float32)
        return y + b

    x2 = _layer_norm(x, params["n1w"], params["n1b"])
    qk_in = (x2 + pos_emb).reshape(S * B, E)
    v_in = x2.reshape(S * B, E)
    q = linear(qk_in, params["wq"] * scale, params["bq"] * scale).reshape(S, B, H, hd)
    k = linear(qk_in, params["wk"], params["bk"]).reshape(S, B, H, hd)
    v = linear(v_in, params["wv"], params["bv"]).reshape(S, B, H, hd)

    sc = jnp.einsum("sbhd,tbhd->bhst", cast(q), cast(k),
                    preferred_element_type=jnp.float32)       # scale already in Wq
    sc = sc - sc.max(-1, keepdims=True)
    p = jnp.exp(sc)
    denom = p.sum(-1, keepdims=True)                          # (B,H,S,1)
    o = jnp.einsum("bhst,tbhd->sbhd", cast(p), cast(v),
                   preferred_element_type=jnp.float32)
    o = o / denom.transpose(2, 0, 1, 3)                       # post-PV normalization

    attn_out = linear(o.reshape(S * B, E), params["wo"], params["bo"]).reshape(S, B, E)
    x = x + attn_out
    x2 = _layer_norm(x, params["n2w"], params["n2b"])
    h1 = gelu(linear(x2.reshape(S * B, E), params["w1"], params["b1"]))
    h2 = linear(h1, params["w2"], params["b2"]).reshape(S, B, E)
    return x + h2


# ---------------------------------------------------------------------------
# deterministic parameter init (shapes follow the PyTorch module __init__;
# the single (3E,E) in_proj matrix is split into wq/wk/wv — equivalent math)
# ---------------------------------------------------------------------------
def init_params(key, embed_dim, mlp_dim):
    E, M = embed_dim, mlp_dim
    ks = jax.random.split(key, 12)

    def w(k, shape, scale=0.05):
        return (scale * jax.random.normal(k, shape)).astype(jnp.float32)

    return dict(
        n1w=jnp.ones((1, E), jnp.float32), n1b=jnp.zeros((1, E), jnp.float32),
        wq=w(ks[0], (E, E)), bq=w(ks[1], (1, E)),
        wk=w(ks[2], (E, E)), bk=w(ks[3], (1, E)),
        wv=w(ks[4], (E, E)), bv=w(ks[5], (1, E)),
        wo=w(ks[6], (E, E)), bo=w(ks[7], (1, E)),
        n2w=jnp.ones((1, E), jnp.float32), n2b=jnp.zeros((1, E), jnp.float32),
        w1=w(ks[8], (M, E)), b1=w(ks[9], (1, M)),
        w2=w(ks[10], (E, M)), b2=w(ks[11], (1, E)),
    )


if __name__ == "__main__":
    # NOTE: intentionally small shapes (heavily padded vregs) — representative
    # performance needs E, M, tn as multiples of 256 and hd >= 128.
    S, B, E, NHEAD, MLP = 8, 2, 32, 8, 64

    key = jax.random.PRNGKey(0)
    kx, kp, kpos = jax.random.split(key, 3)
    x = jax.random.normal(kx, (S, B, E), jnp.float32)          # [seq, batch, embed]
    pos = 0.1 * jax.random.normal(kpos, (S, B, E), jnp.float32)
    params = init_params(kp, E, MLP)

    fn = jax.jit(functools.partial(attention_layer, nhead=NHEAD))
    out = jax.block_until_ready(fn(x, params, pos))

    ref_same = attention_layer_ref(x, params, pos, nhead=NHEAD, mxu_bf16=True)
    ref_f32 = attention_layer_ref(x, params, pos, nhead=NHEAD, mxu_bf16=False)
    err_same = float(jnp.max(jnp.abs(out - ref_same)))
    err_f32 = float(jnp.max(jnp.abs(out - ref_f32)))

    assert out.shape == (S, B, E) and out.dtype == jnp.float32
    assert err_same < 5e-3, f"mismatch vs same-math reference: {err_same}"
    assert err_f32 < 5e-2, f"mismatch vs f32 reference: {err_f32}"

    print("KERNEL_OK")
</pallas_src>

<mosaic_0001>
module attributes {stable_mosaic.version = 11 : i64} {
  func.func @_proj_kernel(%arg0: i32, %arg1: memref<8x32xf32, #tpu.memory_space<vmem>>, %arg2: memref<8x32xf32, #tpu.memory_space<vmem>>, %arg3: memref<1x32xf32, #tpu.memory_space<vmem>>, %arg4: memref<1x32xf32, #tpu.memory_space<vmem>>, %arg5: memref<32x64xbf16, #tpu.memory_space<vmem>>, %arg6: memref<1x64xf32, #tpu.memory_space<vmem>>, %arg7: memref<32x32xbf16, #tpu.memory_space<vmem>>, %arg8: memref<1x32xf32, #tpu.memory_space<vmem>>, %arg9: memref<8x32xbf16, #tpu.memory_space<vmem>>, %arg10: memref<8x32xbf16, #tpu.memory_space<vmem>>, %arg11: memref<8x32xbf16, #tpu.memory_space<vmem>>) attributes {dimension_semantics = [#tpu.dimension_semantics<parallel>], iteration_bounds = array<i64: 2>, scalar_prefetch = 0 : i64, scratch_operands = 0 : i64, tpu.core_type = #tpu.core_type<tc>, window_params = [{transform_indices = @transform_0, window_bounds = array<i64: 8, 32>}, {transform_indices = @transform_1, window_bounds = array<i64: 8, 32>}, {pipeline_mode = #tpu.pipeline_mode<synchronous>, transform_indices = @transform_2, window_bounds = array<i64: 1, 32>}, {pipeline_mode = #tpu.pipeline_mode<synchronous>, transform_indices = @transform_3, window_bounds = array<i64: 1, 32>}, {pipeline_mode = #tpu.pipeline_mode<synchronous>, transform_indices = @transform_4, window_bounds = array<i64: 32, 64>}, {pipeline_mode = #tpu.pipeline_mode<synchronous>, transform_indices = @transform_5, window_bounds = array<i64: 1, 64>}, {pipeline_mode = #tpu.pipeline_mode<synchronous>, transform_indices = @transform_6, window_bounds = array<i64: 32, 32>}, {pipeline_mode = #tpu.pipeline_mode<synchronous>, transform_indices = @transform_7, window_bounds = array<i64: 1, 32>}, {transform_indices = @transform_8, window_bounds = array<i64: 8, 32>}, {transform_indices = @transform_9, window_bounds = array<i64: 8, 32>}, {transform_indices = @transform_10, window_bounds = array<i64: 8, 32>}]} {
    %c0 = arith.constant 0 : index
    %c0_0 = arith.constant 0 : index
    %0 = vector.load %arg1[%c0, %c0_0] : memref<8x32xf32, #tpu.memory_space<vmem>>, vector<8x32xf32>
    %c0_1 = arith.constant 0 : index
    %c0_2 = arith.constant 0 : index
    %1 = vector.load %arg3[%c0_1, %c0_2] : memref<1x32xf32, #tpu.memory_space<vmem>>, vector<1x32xf32>
    %c0_3 = arith.constant 0 : index
    %c0_4 = arith.constant 0 : index
    %2 = vector.load %arg4[%c0_3, %c0_4] : memref<1x32xf32, #tpu.memory_space<vmem>>, vector<1x32xf32>
    %cst = arith.constant dense<0.000000e+00> : vector<8xf32>
    %3 = vector.multi_reduction <add>, %0, %cst [1] : vector<8x32xf32> to vector<8xf32>
    %4 = vector.shape_cast %3 : vector<8xf32> to vector<8x1xf32>
    %cst_5 = arith.constant 3.200000e+01 : f32
    %5 = vector.broadcast %cst_5 : f32 to vector<8x1xf32>
    %6 = arith.divf %4, %5 : vector<8x1xf32>
    %7 = vector.broadcast %6 : vector<8x1xf32> to vector<8x32xf32>
    %8 = arith.subf %0, %7 : vector<8x32xf32>
    %9 = arith.mulf %8, %8 : vector<8x32xf32>
    %cst_6 = arith.constant dense<0.000000e+00> : vector<8xf32>
    %10 = vector.multi_reduction <add>, %9, %cst_6 [1] : vector<8x32xf32> to vector<8xf32>
    %11 = vector.shape_cast %10 : vector<8xf32> to vector<8x1xf32>
    %cst_7 = arith.constant 3.200000e+01 : f32
    %12 = vector.broadcast %cst_7 : f32 to vector<8x1xf32>
    %13 = arith.divf %11, %12 : vector<8x1xf32>
    %14 = vector.broadcast %6 : vector<8x1xf32> to vector<8x32xf32>
    %15 = arith.subf %0, %14 : vector<8x32xf32>
    %cst_8 = arith.constant 9.99999974E-6 : f32
    %16 = vector.broadcast %cst_8 : f32 to vector<8x1xf32>
    %17 = arith.addf %13, %16 : vector<8x1xf32>
    %18 = math.rsqrt %17 : vector<8x1xf32>
    %19 = vector.broadcast %18 : vector<8x1xf32> to vector<8x32xf32>
    %20 = arith.mulf %15, %19 : vector<8x32xf32>
    %21 = vector.broadcast %1 : vector<1x32xf32> to vector<8x32xf32>
    %22 = arith.mulf %20, %21 : vector<8x32xf32>
    %23 = vector.broadcast %2 : vector<1x32xf32> to vector<8x32xf32>
    %24 = arith.addf %22, %23 : vector<8x32xf32>
    %c0_9 = arith.constant 0 : index
    %c0_10 = arith.constant 0 : index
    %25 = vector.load %arg2[%c0_9, %c0_10] : memref<8x32xf32, #tpu.memory_space<vmem>>, vector<8x32xf32>
    %26 = arith.addf %24, %25 : vector<8x32xf32>
    %c0_11 = arith.constant 0 : index
    %c0_12 = arith.constant 0 : index
    %27 = vector.load %arg5[%c0_11, %c0_12] : memref<32x64xbf16, #tpu.memory_space<vmem>>, vector<32x64xbf16>
    %c0_13 = arith.constant 0 : index
    %c0_14 = arith.constant 0 : index
    %28 = vector.load %arg6[%c0_13, %c0_14] : memref<1x64xf32, #tpu.memory_space<vmem>>, vector<1x64xf32>
    %29 = arith.truncf %26 : vector<8x32xf32> to vector<8x32xbf16>
    %cst_15 = arith.constant dense<0.000000e+00> : vector<8x64xf32>
    %30 = tpu.matmul %29, %27, %cst_15 {dimension_numbers = #tpu.dot_dimension_numbers<[1], [0], [0], [1], [0, 0, 1, 1], [], []>} : vector<8x32xbf16>, vector<32x64xbf16>, vector<8x64xf32> -> vector<8x64xf32>
    %31 = vector.broadcast %28 : vector<1x64xf32> to vector<8x64xf32>
    %32 = arith.addf %30, %31 : vector<8x64xf32>
    %c0_16 = arith.constant 0 : index
    %c0_17 = arith.constant 0 : index
    %33 = vector.load %arg7[%c0_16, %c0_17] : memref<32x32xbf16, #tpu.memory_space<vmem>>, vector<32x32xbf16>
    %c0_18 = arith.constant 0 : index
    %c0_19 = arith.constant 0 : index
    %34 = vector.load %arg8[%c0_18, %c0_19] : memref<1x32xf32, #tpu.memory_space<vmem>>, vector<1x32xf32>
    %35 = arith.truncf %24 : vector<8x32xf32> to vector<8x32xbf16>
    %cst_20 = arith.constant dense<0.000000e+00> : vector<8x32xf32>
    %36 = tpu.matmul %35, %33, %cst_20 {dimension_numbers = #tpu.dot_dimension_numbers<[1], [0], [0], [1], [0, 0, 1, 1], [], []>} : vector<8x32xbf16>, vector<32x32xbf16>, vector<8x32xf32> -> vector<8x32xf32>
    %37 = vector.broadcast %34 : vector<1x32xf32> to vector<8x32xf32>
    %38 = arith.addf %36, %37 : vector<8x32xf32>
    %39 = vector.extract_strided_slice %32 {offsets = [0, 0], sizes = [8, 32], strides = [1, 1]} : vector<8x64xf32> to vector<8x32xf32>
    %40 = arith.truncf %39 : vector<8x32xf32> to vector<8x32xbf16>
    %c0_21 = arith.constant 0 : index
    %c0_22 = arith.constant 0 : index
    %41 = vector.load %arg9[%c0_21, %c0_22] : memref<8x32xbf16, #tpu.memory_space<vmem>>, vector<8x32xbf16>
    tpu.vector_store %arg9[%c0_21, %c0_22], %40 {strides = array<i32>} : memref<8x32xbf16, #tpu.memory_space<vmem>>, vector<8x32xbf16>,
    %42 = vector.extract_strided_slice %32 {offsets = [0, 32], sizes = [8, 32], strides = [1, 1]} : vector<8x64xf32> to vector<8x32xf32>
    %43 = arith.truncf %42 : vector<8x32xf32> to vector<8x32xbf16>
    %c0_23 = arith.constant 0 : index
    %c0_24 = arith.constant 0 : index
    %44 = vector.load %arg10[%c0_23, %c0_24] : memref<8x32xbf16, #tpu.memory_space<vmem>>, vector<8x32xbf16>
    tpu.vector_store %arg10[%c0_23, %c0_24], %43 {strides = array<i32>} : memref<8x32xbf16, #tpu.memory_space<vmem>>, vector<8x32xbf16>,
    %45 = arith.truncf %38 : vector<8x32xf32> to vector<8x32xbf16>
    %c0_25 = arith.constant 0 : index
    %c0_26 = arith.constant 0 : index
    %46 = vector.load %arg11[%c0_25, %c0_26] : memref<8x32xbf16, #tpu.memory_space<vmem>>, vector<8x32xbf16>
    tpu.vector_store %arg11[%c0_25, %c0_26], %45 {strides = array<i32>} : memref<8x32xbf16, #tpu.memory_space<vmem>>, vector<8x32xbf16>,
    return
  }
  func.func @transform_0(%arg0: i32) -> (i32, i32) {
    %c0_i32 = arith.constant 0 : i32
    %c0_i32_0 = arith.constant 0 : i32
    return %arg0, %c0_i32 : i32, i32
  }
  func.func @transform_1(%arg0: i32) -> (i32, i32) {
    %c0_i32 = arith.constant 0 : i32
    %c0_i32_0 = arith.constant 0 : i32
    return %arg0, %c0_i32 : i32, i32
  }
  func.func @transform_2(%arg0: i32) -> (i32, i32) {
    %c0_i32 = arith.constant 0 : i32
    %c0_i32_0 = arith.constant 0 : i32
    %c0_i32_1 = arith.constant 0 : i32
    return %c0_i32, %c0_i32_0 : i32, i32
  }
  func.func @transform_3(%arg0: i32) -> (i32, i32) {
    %c0_i32 = arith.constant 0 : i32
    %c0_i32_0 = arith.constant 0 : i32
    %c0_i32_1 = arith.constant 0 : i32
    return %c0_i32, %c0_i32_0 : i32, i32
  }
  func.func @transform_4(%arg0: i32) -> (i32, i32) {
    %c0_i32 = arith.constant 0 : i32
    %c0_i32_0 = arith.constant 0 : i32
    %c0_i32_1 = arith.constant 0 : i32
    return %c0_i32, %c0_i32_0 : i32, i32
  }
  func.func @transform_5(%arg0: i32) -> (i32, i32) {
    %c0_i32 = arith.constant 0 : i32
    %c0_i32_0 = arith.constant 0 : i32
    %c0_i32_1 = arith.constant 0 : i32
    return %c0_i32, %c0_i32_0 : i32, i32
  }
  func.func @transform_6(%arg0: i32) -> (i32, i32) {
    %c0_i32 = arith.constant 0 : i32
    %c0_i32_0 = arith.constant 0 : i32
    %c0_i32_1 = arith.constant 0 : i32
    return %c0_i32, %c0_i32_0 : i32, i32
  }
  func.func @transform_7(%arg0: i32) -> (i32, i32) {
    %c0_i32 = arith.constant 0 : i32
    %c0_i32_0 = arith.constant 0 : i32
    %c0_i32_1 = arith.constant 0 : i32
    return %c0_i32, %c0_i32_0 : i32, i32
  }
  func.func @transform_8(%arg0: i32) -> (i32, i32) {
    %c0_i32 = arith.constant 0 : i32
    %c0_i32_0 = arith.constant 0 : i32
    return %arg0, %c0_i32 : i32, i32
  }
  func.func @transform_9(%arg0: i32) -> (i32, i32) {
    %c0_i32 = arith.constant 0 : i32
    %c0_i32_0 = arith.constant 0 : i32
    return %arg0, %c0_i32 : i32, i32
  }
  func.func @transform_10(%arg0: i32) -> (i32, i32) {
    %c0_i32 = arith.constant 0 : i32
    %c0_i32_0 = arith.constant 0 : i32
    return %arg0, %c0_i32 : i32, i32
  }
}

module attributes {stable_mosaic.version = 11 : i64} {
  func.func @_attn_kernel(%arg0: i32, %arg1: i32, %arg2: memref<8x1x1x32xf32, #tpu.memory_space<vmem>>, %arg3: memref<1x8x8x4xbf16, #tpu.memory_space<vmem>>, %arg4: memref<1x8x8x4xbf16, #tpu.memory_space<vmem>>, %arg5: memref<1x8x8x4xbf16, #tpu.memory_space<vmem>>, %arg6: memref<8x4x32xbf16, #tpu.memory_space<vmem>>, %arg7: memref<1x32xf32, #tpu.memory_space<vmem>>, %arg8: memref<8x1x1x32xf32, #tpu.memory_space<vmem>>) attributes {dimension_semantics = [#tpu.dimension_semantics<parallel>, #tpu.dimension_semantics<arbitrary>], iteration_bounds = array<i64: 2, 1>, scalar_prefetch = 0 : i64, scratch_operands = 0 : i64, tpu.core_type = #tpu.core_type<tc>, window_params = [{transform_indices = @transform_0, window_bounds = array<i64: 8, 1, 1, 32>}, {transform_indices = @transform_1, window_bounds = array<i64: 1, 8, 8, 4>}, {transform_indices = @transform_2, window_bounds = array<i64: 1, 8, 8, 4>}, {transform_indices = @transform_3, window_bounds = array<i64: 1, 8, 8, 4>}, {transform_indices = @transform_4, window_bounds = array<i64: 8, 4, 32>}, {pipeline_mode = #tpu.pipeline_mode<synchronous>, transform_indices = @transform_5, window_bounds = array<i64: 1, 32>}, {transform_indices = @transform_6, window_bounds = array<i64: 8, 1, 1, 32>}]} {
    %c0 = arith.constant 0 : index
    %c0_0 = arith.constant 0 : index
    %c0_1 = arith.constant 0 : index
    %c0_2 = arith.constant 0 : index
    %0 = vector.load %arg3[%c0, %c0_0, %c0_1, %c0_2] : memref<1x8x8x4xbf16, #tpu.memory_space<vmem>>, vector<1x8x8x4xbf16>
    %1 = vector.shape_cast %0 : vector<1x8x8x4xbf16> to vector<8x8x4xbf16>
    %c0_3 = arith.constant 0 : index
    %c0_4 = arith.constant 0 : index
    %c0_5 = arith.constant 0 : index
    %c0_6 = arith.constant 0 : index
    %2 = vector.load %arg4[%c0_3, %c0_4, %c0_5, %c0_6] : memref<1x8x8x4xbf16, #tpu.memory_space<vmem>>, vector<1x8x8x4xbf16>
    %3 = vector.shape_cast %2 : vector<1x8x8x4xbf16> to vector<8x8x4xbf16>
    %c0_7 = arith.constant 0 : index
    %c0_8 = arith.constant 0 : index
    %c0_9 = arith.constant 0 : index
    %c0_10 = arith.constant 0 : index
    %4 = vector.load %arg5[%c0_7, %c0_8, %c0_9, %c0_10] : memref<1x8x8x4xbf16, #tpu.memory_space<vmem>>, vector<1x8x8x4xbf16>
    %5 = vector.shape_cast %4 : vector<1x8x8x4xbf16> to vector<8x8x4xbf16>
    "tpu.trace_start"() <{level = 10 : i32, message = "hsd,htd->hst"}> : () -> ()
    %cst = arith.constant dense<0.000000e+00> : vector<8x8x8xf32>
    %6 = tpu.matmul %1, %3, %cst {dimension_numbers = #tpu.dot_dimension_numbers<[2], [2], [1], [1], [0, 0, 0, 1, 1, 1], [0], [0]>} : vector<8x8x4xbf16>, vector<8x8x4xbf16>, vector<8x8x8xf32> -> vector<8x8x8xf32>
    "tpu.trace_stop"() : () -> ()
    %cst_11 = arith.constant dense<0xFF800000> : vector<8x8xf32>
    %7 = vector.multi_reduction <maximumf>, %6, %cst_11 [2] : vector<8x8x8xf32> to vector<8x8xf32>
    %8 = vector.shape_cast %7 : vector<8x8xf32> to vector<8x8x1xf32>
    %9 = vector.broadcast %8 : vector<8x8x1xf32> to vector<8x8x8xf32>
    %10 = arith.subf %6, %9 : vector<8x8x8xf32>
    %11 = math.exp %10 : vector<8x8x8xf32>
    %cst_12 = arith.constant dense<0.000000e+00> : vector<8x8xf32>
    %12 = vector.multi_reduction <add>, %11, %cst_12 [2] : vector<8x8x8xf32> to vector<8x8xf32>
    %13 = vector.shape_cast %12 : vector<8x8xf32> to vector<8x8x1xf32>
    %14 = arith.truncf %11 : vector<8x8x8xf32> to vector<8x8x8xbf16>
    "tpu.trace_start"() <{level = 10 : i32, message = "hst,htd->hsd"}> : () -> ()
    %cst_13 = arith.constant dense<0.000000e+00> : vector<8x8x4xf32>
    %15 = tpu.matmul %14, %5, %cst_13 {dimension_numbers = #tpu.dot_dimension_numbers<[2], [1], [1], [2], [0, 0, 0, 1, 1, 2], [0], [0]>} : vector<8x8x8xbf16>, vector<8x8x4xbf16>, vector<8x8x4xf32> -> vector<8x8x4xf32>
    "tpu.trace_stop"() : () -> ()
    %16 = tpu.reciprocal %13 {approx = true} : vector<8x8x1xf32> -> vector<8x8x1xf32>
    %17 = vector.broadcast %16 : vector<8x8x1xf32> to vector<8x8x4xf32>
    %18 = arith.mulf %15, %17 : vector<8x8x4xf32>
    %19 = arith.truncf %18 : vector<8x8x4xf32> to vector<8x8x4xbf16>
    %20 = vector.extract_strided_slice %19 {offsets = [0, 0, 0], sizes = [1, 8, 4], strides = [1, 1, 1]} : vector<8x8x4xbf16> to vector<1x8x4xbf16>
    %21 = vector.shape_cast %20 : vector<1x8x4xbf16> to vector<8x4xbf16>
    %c0_14 = arith.constant 0 : index
    %c0_15 = arith.constant 0 : index
    %c0_16 = arith.constant 0 : index
    %22 = vector.load %arg6[%c0_14, %c0_15, %c0_16] : memref<8x4x32xbf16, #tpu.memory_space<vmem>>, vector<1x4x32xbf16>
    %23 = vector.shape_cast %22 : vector<1x4x32xbf16> to vector<4x32xbf16>
    %cst_17 = arith.constant dense<0.000000e+00> : vector<8x32xf32>
    %24 = tpu.matmul %21, %23, %cst_17 {dimension_numbers = #tpu.dot_dimension_numbers<[1], [0], [0], [1], [0, 0, 1, 1], [], []>} : vector<8x4xbf16>, vector<4x32xbf16>, vector<8x32xf32> -> vector<8x32xf32>
    %25 = vector.extract_strided_slice %19 {offsets = [1, 0, 0], sizes = [1, 8, 4], strides = [1, 1, 1]} : vector<8x8x4xbf16> to vector<1x8x4xbf16>
    %26 = vector.shape_cast %25 : vector<1x8x4xbf16> to vector<8x4xbf16>
    %c1 = arith.constant 1 : index
    %c0_18 = arith.constant 0 : index
    %c0_19 = arith.constant 0 : index
    %27 = vector.load %arg6[%c1, %c0_18, %c0_19] : memref<8x4x32xbf16, #tpu.memory_space<vmem>>, vector<1x4x32xbf16>
    %28 = vector.shape_cast %27 : vector<1x4x32xbf16> to vector<4x32xbf16>
    %cst_20 = arith.constant dense<0.000000e+00> : vector<8x32xf32>
    %29 = tpu.matmul %26, %28, %cst_20 {dimension_numbers = #tpu.dot_dimension_numbers<[1], [0], [0], [1], [0, 0, 1, 1], [], []>} : vector<8x4xbf16>, vector<4x32xbf16>, vector<8x32xf32> -> vector<8x32xf32>
    %30 = arith.addf %24, %29 : vector<8x32xf32>
    %31 = vector.extract_strided_slice %19 {offsets = [2, 0, 0], sizes = [1, 8, 4], strides = [1, 1, 1]} : vector<8x8x4xbf16> to vector<1x8x4xbf16>
    %32 = vector.shape_cast %31 : vector<1x8x4xbf16> to vector<8x4xbf16>
    %c2 = arith.constant 2 : index
    %c0_21 = arith.constant 0 : index
    %c0_22 = arith.constant 0 : index
    %33 = vector.load %arg6[%c2, %c0_21, %c0_22] : memref<8x4x32xbf16, #tpu.memory_space<vmem>>, vector<1x4x32xbf16>
    %34 = vector.shape_cast %33 : vector<1x4x32xbf16> to vector<4x32xbf16>
    %cst_23 = arith.constant dense<0.000000e+00> : vector<8x32xf32>
    %35 = tpu.matmul %32, %34, %cst_23 {dimension_numbers = #tpu.dot_dimension_numbers<[1], [0], [0], [1], [0, 0, 1, 1], [], []>} : vector<8x4xbf16>, vector<4x32xbf16>, vector<8x32xf32> -> vector<8x32xf32>
    %36 = arith.addf %30, %35 : vector<8x32xf32>
    %37 = vector.extract_strided_slice %19 {offsets = [3, 0, 0], sizes = [1, 8, 4], strides = [1, 1, 1]} : vector<8x8x4xbf16> to vector<1x8x4xbf16>
    %38 = vector.shape_cast %37 : vector<1x8x4xbf16> to vector<8x4xbf16>
    %c3 = arith.constant 3 : index
    %c0_24 = arith.constant 0 : index
    %c0_25 = arith.constant 0 : index
    %39 = vector.load %arg6[%c3, %c0_24, %c0_25] : memref<8x4x32xbf16, #tpu.memory_space<vmem>>, vector<1x4x32xbf16>
    %40 = vector.shape_cast %39 : vector<1x4x32xbf16> to vector<4x32xbf16>
    %cst_26 = arith.constant dense<0.000000e+00> : vector<8x32xf32>
    %41 = tpu.matmul %38, %40, %cst_26 {dimension_numbers = #tpu.dot_dimension_numbers<[1], [0], [0], [1], [0, 0, 1, 1], [], []>} : vector<8x4xbf16>, vector<4x32xbf16>, vector<8x32xf32> -> vector<8x32xf32>
    %42 = arith.addf %36, %41 : vector<8x32xf32>
    %43 = vector.extract_strided_slice %19 {offsets = [4, 0, 0], sizes = [1, 8, 4], strides = [1, 1, 1]} : vector<8x8x4xbf16> to vector<1x8x4xbf16>
    %44 = vector.shape_cast %43 : vector<1x8x4xbf16> to vector<8x4xbf16>
    %c4 = arith.constant 4 : index
    %c0_27 = arith.constant 0 : index
    %c0_28 = arith.constant 0 : index
    %45 = vector.load %arg6[%c4, %c0_27, %c0_28] : memref<8x4x32xbf16, #tpu.memory_space<vmem>>, vector<1x4x32xbf16>
    %46 = vector.shape_cast %45 : vector<1x4x32xbf16> to vector<4x32xbf16>
    %cst_29 = arith.constant dense<0.000000e+00> : vector<8x32xf32>
    %47 = tpu.matmul %44, %46, %cst_29 {dimension_numbers = #tpu.dot_dimension_numbers<[1], [0], [0], [1], [0, 0, 1, 1], [], []>} : vector<8x4xbf16>, vector<4x32xbf16>, vector<8x32xf32> -> vector<8x32xf32>
    %48 = arith.addf %42, %47 : vector<8x32xf32>
    %49 = vector.extract_strided_slice %19 {offsets = [5, 0, 0], sizes = [1, 8, 4], strides = [1, 1, 1]} : vector<8x8x4xbf16> to vector<1x8x4xbf16>
    %50 = vector.shape_cast %49 : vector<1x8x4xbf16> to vector<8x4xbf16>
    %c5 = arith.constant 5 : index
    %c0_30 = arith.constant 0 : index
    %c0_31 = arith.constant 0 : index
    %51 = vector.load %arg6[%c5, %c0_30, %c0_31] : memref<8x4x32xbf16, #tpu.memory_space<vmem>>, vector<1x4x32xbf16>
    %52 = vector.shape_cast %51 : vector<1x4x32xbf16> to vector<4x32xbf16>
    %cst_32 = arith.constant dense<0.000000e+00> : vector<8x32xf32>
    %53 = tpu.matmul %50, %52, %cst_32 {dimension_numbers = #tpu.dot_dimension_numbers<[1], [0], [0], [1], [0, 0, 1, 1], [], []>} : vector<8x4xbf16>, vector<4x32xbf16>, vector<8x32xf32> -> vector<8x32xf32>
    %54 = arith.addf %48, %53 : vector<8x32xf32>
    %55 = vector.extract_strided_slice %19 {offsets = [6, 0, 0], sizes = [1, 8, 4], strides = [1, 1, 1]} : vector<8x8x4xbf16> to vector<1x8x4xbf16>
    %56 = vector.shape_cast %55 : vector<1x8x4xbf16> to vector<8x4xbf16>
    %c6 = arith.constant 6 : index
    %c0_33 = arith.constant 0 : index
    %c0_34 = arith.constant 0 : index
    %57 = vector.load %arg6[%c6, %c0_33, %c0_34] : memref<8x4x32xbf16, #tpu.memory_space<vmem>>, vector<1x4x32xbf16>
    %58 = vector.shape_cast %57 : vector<1x4x32xbf16> to vector<4x32xbf16>
    %cst_35 = arith.constant dense<0.000000e+00> : vector<8x32xf32>
    %59 = tpu.matmul %56, %58, %cst_35 {dimension_numbers = #tpu.dot_dimension_numbers<[1], [0], [0], [1], [0, 0, 1, 1], [], []>} : vector<8x4xbf16>, vector<4x32xbf16>, vector<8x32xf32> -> vector<8x32xf32>
    %60 = arith.addf %54, %59 : vector<8x32xf32>
    %61 = vector.extract_strided_slice %19 {offsets = [7, 0, 0], sizes = [1, 8, 4], strides = [1, 1, 1]} : vector<8x8x4xbf16> to vector<1x8x4xbf16>
    %62 = vector.shape_cast %61 : vector<1x8x4xbf16> to vector<8x4xbf16>
    %c7 = arith.constant 7 : index
    %c0_36 = arith.constant 0 : index
    %c0_37 = arith.constant 0 : index
    %63 = vector.load %arg6[%c7, %c0_36, %c0_37] : memref<8x4x32xbf16, #tpu.memory_space<vmem>>, vector<1x4x32xbf16>
    %64 = vector.shape_cast %63 : vector<1x4x32xbf16> to vector<4x32xbf16>
    %cst_38 = arith.constant dense<0.000000e+00> : vector<8x32xf32>
    %65 = tpu.matmul %62, %64, %cst_38 {dimension_numbers = #tpu.dot_dimension_numbers<[1], [0], [0], [1], [0, 0, 1, 1], [], []>} : vector<8x4xbf16>, vector<4x32xbf16>, vector<8x32xf32> -> vector<8x32xf32>
    %66 = arith.addf %60, %65 : vector<8x32xf32>
    %c0_i32 = arith.constant 0 : i32
    %67 = arith.cmpi eq, %arg1, %c0_i32 : i32
    %68 = arith.extui %67 : i1 to i32
    %c0_i32_39 = arith.constant 0 : i32
    %69 = arith.cmpi ne, %68, %c0_i32_39 : i32
    scf.if %69 {
      %c0_48 = arith.constant 0 : index
      %c0_49 = arith.constant 0 : index
      %c0_50 = arith.constant 0 : index
      %c0_51 = arith.constant 0 : index
      %76 = vector.load %arg2[%c0_48, %c0_49, %c0_50, %c0_51] : memref<8x1x1x32xf32, #tpu.memory_space<vmem>>, vector<8x1x1x32xf32>
      %77 = vector.shape_cast %76 : vector<8x1x1x32xf32> to vector<8x32xf32>
      %c0_52 = arith.constant 0 : index
      %c0_53 = arith.constant 0 : index
      %78 = vector.load %arg7[%c0_52, %c0_53] : memref<1x32xf32, #tpu.memory_space<vmem>>, vector<1x32xf32>
      %79 = vector.broadcast %78 : vector<1x32xf32> to vector<8x32xf32>
      %80 = arith.addf %77, %79 : vector<8x32xf32>
      %c0_54 = arith.constant 0 : index
      %c0_55 = arith.constant 0 : index
      %c0_56 = arith.constant 0 : index
      %c0_57 = arith.constant 0 : index
      %81 = vector.load %arg8[%c0_54, %c0_55, %c0_56, %c0_57] : memref<8x1x1x32xf32, #tpu.memory_space<vmem>>, vector<8x1x1x32xf32>
      %82 = vector.shape_cast %81 : vector<8x1x1x32xf32> to vector<8x32xf32>
      %83 = vector.shape_cast %80 : vector<8x32xf32> to vector<8x1x1x32xf32>
      tpu.vector_store %arg8[%c0_54, %c0_55, %c0_56, %c0_57], %83 {strides = array<i32>} : memref<8x1x1x32xf32, #tpu.memory_space<vmem>>, vector<8x1x1x32xf32>,
    } else {
    }
    %c0_40 = arith.constant 0 : index
    %c0_41 = arith.constant 0 : index
    %c0_42 = arith.constant 0 : index
    %c0_43 = arith.constant 0 : index
    %70 = vector.load %arg8[%c0_40, %c0_41, %c0_42, %c0_43] : memref<8x1x1x32xf32, #tpu.memory_space<vmem>>, vector<8x1x1x32xf32>
    %71 = vector.shape_cast %70 : vector<8x1x1x32xf32> to vector<8x32xf32>
    %72 = arith.addf %71, %66 : vector<8x32xf32>
    %c0_44 = arith.constant 0 : index
    %c0_45 = arith.constant 0 : index
    %c0_46 = arith.constant 0 : index
    %c0_47 = arith.constant 0 : index
    %73 = vector.load %arg8[%c0_44, %c0_45, %c0_46, %c0_47] : memref<8x1x1x32xf32, #tpu.memory_space<vmem>>, vector<8x1x1x32xf32>
    %74 = vector.shape_cast %73 : vector<8x1x1x32xf32> to vector<8x32xf32>
    %75 = vector.shape_cast %72 : vector<8x32xf32> to vector<8x1x1x32xf32>
    tpu.vector_store %arg8[%c0_44, %c0_45, %c0_46, %c0_47], %75 {strides = array<i32>} : memref<8x1x1x32xf32, #tpu.memory_space<vmem>>, vector<8x1x1x32xf32>,
    return
  }
  func.func @transform_0(%arg0: i32, %arg1: i32) -> (i32, i32, i32, i32) {
    %c0_i32 = arith.constant 0 : i32
    %c0_i32_0 = arith.constant 0 : i32
    %c0_i32_1 = arith.constant 0 : i32
    %c0_i32_2 = arith.constant 0 : i32
    return %c0_i32, %arg0, %c0_i32_0, %c0_i32_1 : i32, i32, i32, i32
  }
  func.func @transform_1(%arg0: i32, %arg1: i32) -> (i32, i32, i32, i32) {
    %c0_i32 = arith.constant 0 : i32
    %c0_i32_0 = arith.constant 0 : i32
    %c0_i32_1 = arith.constant 0 : i32
    return %arg0, %arg1, %c0_i32, %c0_i32_0 : i32, i32, i32, i32
  }
  func.func @transform_2(%arg0: i32, %arg1: i32) -> (i32, i32, i32, i32) {
    %c0_i32 = arith.constant 0 : i32
    %c0_i32_0 = arith.constant 0 : i32
    %c0_i32_1 = arith.constant 0 : i32
    return %arg0, %arg1, %c0_i32, %c0_i32_0 : i32, i32, i32, i32
  }
  func.func @transform_3(%arg0: i32, %arg1: i32) -> (i32, i32, i32, i32) {
    %c0_i32 = arith.constant 0 : i32
    %c0_i32_0 = arith.constant 0 : i32
    %c0_i32_1 = arith.constant 0 : i32
    return %arg0, %arg1, %c0_i32, %c0_i32_0 : i32, i32, i32, i32
  }
  func.func @transform_4(%arg0: i32, %arg1: i32) -> (i32, i32, i32) {
    %c0_i32 = arith.constant 0 : i32
    %c0_i32_0 = arith.constant 0 : i32
    %c0_i32_1 = arith.constant 0 : i32
    return %arg1, %c0_i32, %c0_i32_0 : i32, i32, i32
  }
  func.func @transform_5(%arg0: i32, %arg1: i32) -> (i32, i32) {
    %c0_i32 = arith.constant 0 : i32
    %c0_i32_0 = arith.constant 0 : i32
    %c0_i32_1 = arith.constant 0 : i32
    return %c0_i32, %c0_i32_0 : i32, i32
  }
  func.func @transform_6(%arg0: i32, %arg1: i32) -> (i32, i32, i32, i32) {
    %c0_i32 = arith.constant 0 : i32
    %c0_i32_0 = arith.constant 0 : i32
    %c0_i32_1 = arith.constant 0 : i32
    %c0_i32_2 = arith.constant 0 : i32
    return %c0_i32, %arg0, %c0_i32_0, %c0_i32_1 : i32, i32, i32, i32
  }
}

module attributes {stable_mosaic.version = 11 : i64} {
  func.func @_mlp_kernel(%arg0: i32, %arg1: memref<8x32xf32, #tpu.memory_space<vmem>>, %arg2: memref<1x32xf32, #tpu.memory_space<vmem>>, %arg3: memref<1x32xf32, #tpu.memory_space<vmem>>, %arg4: memref<32x64xbf16, #tpu.memory_space<vmem>>, %arg5: memref<1x64xf32, #tpu.memory_space<vmem>>, %arg6: memref<64x32xbf16, #tpu.memory_space<vmem>>, %arg7: memref<1x32xf32, #tpu.memory_space<vmem>>, %arg8: memref<8x32xf32, #tpu.memory_space<vmem>>) attributes {dimension_semantics = [#tpu.dimension_semantics<parallel>], iteration_bounds = array<i64: 2>, scalar_prefetch = 0 : i64, scratch_operands = 0 : i64, tpu.core_type = #tpu.core_type<tc>, window_params = [{transform_indices = @transform_0, window_bounds = array<i64: 8, 32>}, {pipeline_mode = #tpu.pipeline_mode<synchronous>, transform_indices = @transform_1, window_bounds = array<i64: 1, 32>}, {pipeline_mode = #tpu.pipeline_mode<synchronous>, transform_indices = @transform_2, window_bounds = array<i64: 1, 32>}, {pipeline_mode = #tpu.pipeline_mode<synchronous>, transform_indices = @transform_3, window_bounds = array<i64: 32, 64>}, {pipeline_mode = #tpu.pipeline_mode<synchronous>, transform_indices = @transform_4, window_bounds = array<i64: 1, 64>}, {pipeline_mode = #tpu.pipeline_mode<synchronous>, transform_indices = @transform_5, window_bounds = array<i64: 64, 32>}, {pipeline_mode = #tpu.pipeline_mode<synchronous>, transform_indices = @transform_6, window_bounds = array<i64: 1, 32>}, {transform_indices = @transform_7, window_bounds = array<i64: 8, 32>}]} {
    %c0 = arith.constant 0 : index
    %c0_0 = arith.constant 0 : index
    %0 = vector.load %arg1[%c0, %c0_0] : memref<8x32xf32, #tpu.memory_space<vmem>>, vector<8x32xf32>
    %c0_1 = arith.constant 0 : index
    %c0_2 = arith.constant 0 : index
    %1 = vector.load %arg2[%c0_1, %c0_2] : memref<1x32xf32, #tpu.memory_space<vmem>>, vector<1x32xf32>
    %c0_3 = arith.constant 0 : index
    %c0_4 = arith.constant 0 : index
    %2 = vector.load %arg3[%c0_3, %c0_4] : memref<1x32xf32, #tpu.memory_space<vmem>>, vector<1x32xf32>
    %cst = arith.constant dense<0.000000e+00> : vector<8xf32>
    %3 = vector.multi_reduction <add>, %0, %cst [1] : vector<8x32xf32> to vector<8xf32>
    %4 = vector.shape_cast %3 : vector<8xf32> to vector<8x1xf32>
    %cst_5 = arith.constant 3.200000e+01 : f32
    %5 = vector.broadcast %cst_5 : f32 to vector<8x1xf32>
    %6 = arith.divf %4, %5 : vector<8x1xf32>
    %7 = vector.broadcast %6 : vector<8x1xf32> to vector<8x32xf32>
    %8 = arith.subf %0, %7 : vector<8x32xf32>
    %9 = arith.mulf %8, %8 : vector<8x32xf32>
    %cst_6 = arith.constant dense<0.000000e+00> : vector<8xf32>
    %10 = vector.multi_reduction <add>, %9, %cst_6 [1] : vector<8x32xf32> to vector<8xf32>
    %11 = vector.shape_cast %10 : vector<8xf32> to vector<8x1xf32>
    %cst_7 = arith.constant 3.200000e+01 : f32
    %12 = vector.broadcast %cst_7 : f32 to vector<8x1xf32>
    %13 = arith.divf %11, %12 : vector<8x1xf32>
    %14 = vector.broadcast %6 : vector<8x1xf32> to vector<8x32xf32>
    %15 = arith.subf %0, %14 : vector<8x32xf32>
    %cst_8 = arith.constant 9.99999974E-6 : f32
    %16 = vector.broadcast %cst_8 : f32 to vector<8x1xf32>
    %17 = arith.addf %13, %16 : vector<8x1xf32>
    %18 = math.rsqrt %17 : vector<8x1xf32>
    %19 = vector.broadcast %18 : vector<8x1xf32> to vector<8x32xf32>
    %20 = arith.mulf %15, %19 : vector<8x32xf32>
    %21 = vector.broadcast %1 : vector<1x32xf32> to vector<8x32xf32>
    %22 = arith.mulf %20, %21 : vector<8x32xf32>
    %23 = vector.broadcast %2 : vector<1x32xf32> to vector<8x32xf32>
    %24 = arith.addf %22, %23 : vector<8x32xf32>
    %c0_9 = arith.constant 0 : index
    %c0_10 = arith.constant 0 : index
    %25 = vector.load %arg4[%c0_9, %c0_10] : memref<32x64xbf16, #tpu.memory_space<vmem>>, vector<32x64xbf16>
    %c0_11 = arith.constant 0 : index
    %c0_12 = arith.constant 0 : index
    %26 = vector.load %arg5[%c0_11, %c0_12] : memref<1x64xf32, #tpu.memory_space<vmem>>, vector<1x64xf32>
    %27 = arith.truncf %24 : vector<8x32xf32> to vector<8x32xbf16>
    %cst_13 = arith.constant dense<0.000000e+00> : vector<8x64xf32>
    %28 = tpu.matmul %27, %25, %cst_13 {dimension_numbers = #tpu.dot_dimension_numbers<[1], [0], [0], [1], [0, 0, 1, 1], [], []>} : vector<8x32xbf16>, vector<32x64xbf16>, vector<8x64xf32> -> vector<8x64xf32>
    %29 = vector.broadcast %26 : vector<1x64xf32> to vector<8x64xf32>
    %30 = arith.addf %28, %29 : vector<8x64xf32>
    %cst_14 = arith.constant 5.000000e-01 : f32
    %31 = vector.broadcast %cst_14 : f32 to vector<8x64xf32>
    %32 = arith.mulf %31, %30 : vector<8x64xf32>
    %cst_15 = arith.constant 4.471500e-02 : f32
    %33 = vector.broadcast %cst_15 : f32 to vector<8x64xf32>
    %34 = arith.mulf %33, %30 : vector<8x64xf32>
    %35 = arith.mulf %34, %30 : vector<8x64xf32>
    %36 = arith.mulf %35, %30 : vector<8x64xf32>
    %37 = arith.addf %30, %36 : vector<8x64xf32>
    %cst_16 = arith.constant 0.797884583 : f32
    %38 = vector.broadcast %cst_16 : f32 to vector<8x64xf32>
    %39 = arith.mulf %38, %37 : vector<8x64xf32>
    %40 = math.tanh %39 : vector<8x64xf32>
    %cst_17 = arith.constant 1.000000e+00 : f32
    %41 = vector.broadcast %cst_17 : f32 to vector<8x64xf32>
    %42 = arith.addf %41, %40 : vector<8x64xf32>
    %43 = arith.mulf %32, %42 : vector<8x64xf32>
    %c0_18 = arith.constant 0 : index
    %c0_19 = arith.constant 0 : index
    %44 = vector.load %arg6[%c0_18, %c0_19] : memref<64x32xbf16, #tpu.memory_space<vmem>>, vector<64x32xbf16>
    %c0_20 = arith.constant 0 : index
    %c0_21 = arith.constant 0 : index
    %45 = vector.load %arg7[%c0_20, %c0_21] : memref<1x32xf32, #tpu.memory_space<vmem>>, vector<1x32xf32>
    %46 = arith.truncf %43 : vector<8x64xf32> to vector<8x64xbf16>
    %cst_22 = arith.constant dense<0.000000e+00> : vector<8x32xf32>
    %47 = tpu.matmul %46, %44, %cst_22 {dimension_numbers = #tpu.dot_dimension_numbers<[1], [0], [0], [1], [0, 0, 1, 1], [], []>} : vector<8x64xbf16>, vector<64x32xbf16>, vector<8x32xf32> -> vector<8x32xf32>
    %48 = vector.broadcast %45 : vector<1x32xf32> to vector<8x32xf32>
    %49 = arith.addf %47, %48 : vector<8x32xf32>
    %50 = arith.addf %0, %49 : vector<8x32xf32>
    %c0_23 = arith.constant 0 : index
    %c0_24 = arith.constant 0 : index
    %51 = vector.load %arg8[%c0_23, %c0_24] : memref<8x32xf32, #tpu.memory_space<vmem>>, vector<8x32xf32>
    tpu.vector_store %arg8[%c0_23, %c0_24], %50 {strides = array<i32>} : memref<8x32xf32, #tpu.memory_space<vmem>>, vector<8x32xf32>,
    return
  }
  func.func @transform_0(%arg0: i32) -> (i32, i32) {
    %c0_i32 = arith.constant 0 : i32
    %c0_i32_0 = arith.constant 0 : i32
    return %arg0, %c0_i32 : i32, i32
  }
  func.func @transform_1(%arg0: i32) -> (i32, i32) {
    %c0_i32 = arith.constant 0 : i32
    %c0_i32_0 = arith.constant 0 : i32
    %c0_i32_1 = arith.constant 0 : i32
    return %c0_i32, %c0_i32_0 : i32, i32
  }
  func.func @transform_2(%arg0: i32) -> (i32, i32) {
    %c0_i32 = arith.constant 0 : i32
    %c0_i32_0 = arith.constant 0 : i32
    %c0_i32_1 = arith.constant 0 : i32
    return %c0_i32, %c0_i32_0 : i32, i32
  }
  func.func @transform_3(%arg0: i32) -> (i32, i32) {
    %c0_i32 = arith.constant 0 : i32
    %c0_i32_0 = arith.constant 0 : i32
    %c0_i32_1 = arith.constant 0 : i32
    return %c0_i32, %c0_i32_0 : i32, i32
  }
  func.func @transform_4(%arg0: i32) -> (i32, i32) {
    %c0_i32 = arith.constant 0 : i32
    %c0_i32_0 = arith.constant 0 : i32
    %c0_i32_1 = arith.constant 0 : i32
    return %c0_i32, %c0_i32_0 : i32, i32
  }
  func.func @transform_5(%arg0: i32) -> (i32, i32) {
    %c0_i32 = arith.constant 0 : i32
    %c0_i32_0 = arith.constant 0 : i32
    %c0_i32_1 = arith.constant 0 : i32
    return %c0_i32, %c0_i32_0 : i32, i32
  }
  func.func @transform_6(%arg0: i32) -> (i32, i32) {
    %c0_i32 = arith.constant 0 : i32
    %c0_i32_0 = arith.constant 0 : i32
    %c0_i32_1 = arith.constant 0 : i32
    return %c0_i32, %c0_i32_0 : i32, i32
  }
  func.func @transform_7(%arg0: i32) -> (i32, i32) {
    %c0_i32 = arith.constant 0 : i32
    %c0_i32_0 = arith.constant 0 : i32
    return %arg0, %c0_i32 : i32, i32
  }
}

</mosaic_0001>

<bundles_post_ra>
// kernel: attention_layer.3
= control target key start
LH: loop header
LB: loop body
LE: loop exit
PB: predicated region body
PF: predicated region fallthrough
CT: control target
= control target key end

     0   :  { %s830_s13 = smov 0   ;;  %s892_s0 = inlined_call_operand.vmem [shape: f32[16,32], index: 0, kind: input, shape index: {}]   ;;  %s893_s1 = inlined_call_operand.vmem [shape: f32[16,32], index: 1, kind: input, shape index: {}]   ;;  %s894_s2 = inlined_call_operand.vmem [shape: f32[1,32], index: 2, kind: input, shape index: {}]   ;;  %s895_s3 = inlined_call_operand.vmem [shape: f32[1,32], index: 3, kind: input, shape index: {}]   ;;  %s896_s4 = inlined_call_operand.vmem [shape: bf16[32,64], index: 4, kind: input, shape index: {}]   ;;  %s897_s5 = inlined_call_operand.vmem [shape: f32[1,64], index: 5, kind: input, shape index: {}]   ;;  %s898_s6 = inlined_call_operand.vmem [shape: bf16[32,32], index: 6, kind: input, shape index: {}]   ;;  %s899_s7 = inlined_call_operand.vmem [shape: f32[1,32], index: 7, kind: input, shape index: {}]   ;;  %s900_s8 = inlined_call_operand.vmem [shape: bf16[16,32], index: 8, kind: output, shape index: {0}]   ;;  %s901_s9 = inlined_call_operand.vmem [shape: bf16[16,32], index: 9, kind: output, shape index: {1}]   ;;  %s902_s10 = inlined_call_operand.vmem [shape: bf16[16,32], index: 10, kind: output, shape index: {2}]  }
   0x1 LB: > { %s701_s14 = sadd.s32 4294967295, %s770_s13   ;;  %p705_p0 = scmp.ge.s32.totalorder %s770_s13, 1  ;;  %s770_s13 = sphi %s830_s13, %s21_s13  }
   0x2   : > { %p325_p1 = scmp.lt.s32.totalorder %s770_s13, 3 }
   0x4   : > { %p326_p2 = pnand %p705_p0, %p325_p1 }
   0x5   : > { %p373_p3 = scmp.lt.s32.totalorder (!%p326_p2), %s701_s14, 1  ;;  %vm397_vm0 = vcmask (!%p326_p2), 261120   ;;  %v758_v7 = vld [vmem:[%s898_s6] sm:$0xff] (!%p326_p2)   ;;  %v772_v8 = vmov (!%p326_p2), 0.0   ;;  %v760_v10 = vld [vmem:[%s898_s6 + $0x8] sm:$0xff] (!%p326_p2)   ;;  %vm773_vm1 = vmmov (!%p326_p2), 0  }
   0x6   : > { %329 = sbr.rel (%p326_p2) target bundleno = 666 (0x29a), region = 52  ;;  %739 = vmatprep.subr.bf16.mxu1 (!%p326_p2), %v772_v8  ;;  %731 = vmatprep.subr.bf16.mxu0 (!%p326_p2), %v772_v8  ;;  %v759_v9 = vld [vmem:[%s896_s4] sm:$0xff] (!%p326_p2)   ;;  %v761_v11 = vld [vmem:[%s896_s4 + $0x8] sm:$0xff] (!%p326_p2)   ;;  %vm563_vm2 = vcmask (!%p326_p2), 257024   ;;  %s774_s26 = smov (!%p326_p2), 96  }
   0x7   : > { %740 = vmatpush3.bf16.msra.mxu1 (!%p326_p2), %v758_v7  ;;  %743 = vmatprep.mubr.msk.bf16.mxu1 (!%p326_p2), %vm773_vm1, %v772_v8  ;;  %v711_v16 = vld [vmem:[%s894_s2] ss:$0 sm:$0xff] (!%p326_p2) }
   0x8   : > { %732 = vmatpush3.bf16.msra.mxu0 (!%p326_p2), %v759_v9  ;;  %741 = vmatprep.subr.bf16.mxu1 (!%p326_p2), %v772_v8  ;;  %v712_v18 = vld [vmem:[%s895_s3] ss:$0 sm:$0xff] (!%p326_p2) }
   0x9   : > { %733 = vmatprep.subr.bf16.mxu0 (!%p326_p2), %v772_v8  ;;  %735 = vmatprep.mubr.msk.bf16.mxu0 (!%p326_p2), %vm773_vm1, %v772_v8  ;;  %v717_v25 = vld [vmem:[%s899_s7] ss:$0 sm:$0xff] (!%p326_p2) }
   0xa   : > { %v713_v27 = vld [vmem:[%s897_s5] ss:$0 sm:$0xff] (!%p326_p2) }
   0xb   : > { %742 = vmatpush3.bf16.msra.mxu1 (!%p326_p2), %v760_v10 }
   0xc   : > { %734 = vmatpush3.bf16.msra.mxu0 (!%p326_p2), %v761_v11 }
   0xd   : > { %s904_s14 = smov (!%p373_p3, %s701_s14), 1 }
   0xe   : > { %s706_s15 = sshll.u32 %s904_s14, 3 }
   0xf   : > { %s376_s18 = scalar_lea.vmem %s892_s0, %s706_s15  ;;  %s380_s11 = scalar_lea.vmem %s893_s1, %s706_s15 }
  0x10   : > { %v394_v0 = vld [vmem:[%s376_s18] sm:$0xff]  ;;  %s708_s15 = sshll.u32 %s904_s14, 2 }
  0x11   : > { %v398_v1 = vsel %vm397_vm0, %v394_v0, 0.0  ;;  %v426_v20 = vld [vmem:[%s380_s11] sm:$0xff]  ;;  %s392_s23 = scalar_lea.vmem %s902_s10, %s708_s15  ;;  %s384_s25 = scalar_lea.vmem %s900_s8, %s708_s15 }
  0x12   : > { %399 = vadd.xlane.f32.xlu0 %v398_v1  ;;  %s388_s29 = scalar_lea.vmem %s901_s9, %s708_s15 }
  0x9f   : > { %v400_v2 = vpop.xlane.xlu0 %399 }
  0xa0   : > { %v402_v3 = vmul.f32 0.03125, %v400_v2 }
  0xa2   : > { %v403_v4 = vsub.f32 %v394_v0, %v402_v3 }
  0xa4   : > { %v404_v5 = vmul.f32 %v403_v4, %v403_v4 }
  0xa6   : > { %v405_v6 = vsel %vm397_vm0, %v404_v5, 0.0 }
  0xa7   : > { %406 = vadd.xlane.f32.xlu0 %v405_v6 }
 0x134   : > { %v407_v12 = vpop.xlane.xlu0 %406 }
 0x135   : > { %v408_v13 = vmul.f32 0.03125, %v407_v12 }
 0x137   : > { %v409_v14 = vadd.f32 1e-05, %v408_v13 }
 0x139   : > { %762 = vrsqrt.f32 %v409_v14 }
 0x143   : > { %v763_v15 = vpop.eup %762 }
 0x144   : > { %v411_v17 = vmul.f32 %v763_v15, %v403_v4 }
 0x146   : > { %v418_v19 = vmul.f32 %v711_v16, %v411_v17 }
 0x148   : > { %v425_v21 = vadd.f32 %v712_v18, %v418_v19 }
 0x14a   : > { %v500_v22 = vpack.c.bf16 %v425_v21, %v425_v21  ;;  %v427_v23 = vadd.f32 %v426_v20, %v425_v21 }
 0x14c   : > { %744 = vmatmul.mubr.msk.bf16.vlgmr.msra.gmra.mrb[0].mxu1 %vm397_vm0, %v500_v22  ;;  %v433_v24 = vpack.c.bf16 %v427_v23, %v427_v23 }
 0x14e   : > { %736 = vmatmul.mubr.msk.bf16.vlgmr.msra.gmra.mrb[0].mxu0 %vm397_vm0, %v433_v24 }
 0x21f   : > { %v556_v26 = vpop.f32.mrb[0].mxu1 }
 0x220   : > { %v557_v28 = vadd.f32 %v717_v25, %v556_v26  ;;  %v745_v29 = vpop.f32.mrb[1].mxu1 }
 0x221   : > { %v489_v30 = vpop.f32.mrb[0].mxu0  ;;  %v559_v31 = vpop.f32.mrb[2].mxu1 }
 0x222   : > { %v572_v32 = vpack.c.bf16 %v557_v28, %v557_v28  ;;  %v490_v33 = vadd.f32 %v713_v27, %v489_v30  ;;  %v737_v34 = vpop.f32.mrb[1].mxu0  ;;  %v746_v35 = vpop.f32.mrb[3].mxu1 }
 0x223   : > { %v492_v36 = vpop.f32.mrb[2].mxu0 }
 0x224   : > { %v562_v37 = vpack.c.bf16 %v490_v33, %v490_v33  ;;  %v738_v38 = vpop.f32.mrb[3].mxu0  ;;  %573 = vst.msk [vmem:[%s392_s23] sm:$0xf] %vm563_vm2, %v572_v32 }
 0x226   : > { %568 = vrot.lane.b32.xlu1 %v562_v37, %s774_s26  ;;  %564 = vst.msk [vmem:[%s384_s25] sm:$0xf] %vm563_vm2, %v562_v37 }
 0x298   : > { %v569_v39 = vpop.permute.xlu1 %568 }
 0x299   : > { %571 = vst.msk [vmem:[%s388_s29] sm:$0xf] %vm563_vm2, %v569_v39 }
 0x29a PF: > { %s21_s13 = sadd.s32 1, %s770_s13  }
 0x29b   : > { %p18_p4 = scmp.ge.s32.totalorder %s21_s13, 4  }
 0x29d   :  { %20 = sbr.rel (!%p18_p4) target bundleno = 1 (0x1), region = 109 }

// kernel: attention_layer.5
= control target key start
LH: loop header
LB: loop body
LE: loop exit
PB: predicated region body
PF: predicated region fallthrough
CT: control target
= control target key end

     0   :  { %12 = vsyncpa [#allocation3], 0  ;;  %s889_s0 = inlined_call_operand.vmem [shape: f32[16,32], index: 0, kind: input, shape index: {}]   ;;  %s890_s1 = inlined_call_operand.vmem [shape: f32[1,32], index: 1, kind: input, shape index: {}]   ;;  %s891_s2 = inlined_call_operand.vmem [shape: f32[1,32], index: 2, kind: input, shape index: {}]   ;;  %s892_s3 = inlined_call_operand.vmem [shape: bf16[32,64], index: 3, kind: input, shape index: {}]   ;;  %s893_s4 = inlined_call_operand.vmem [shape: f32[1,64], index: 4, kind: input, shape index: {}]   ;;  %s894_s5 = inlined_call_operand.vmem [shape: bf16[64,32], index: 5, kind: input, shape index: {}]   ;;  %s895_s6 = inlined_call_operand.vmem [shape: f32[1,32], index: 6, kind: input, shape index: {}]   ;;  %s896_s7 = inlined_call_operand.hbm [shape: f32[16,32], index: 7, kind: output, shape index: {}]  }
   0x1   :  { %14 = vsyncpa [#allocation3 + $0x1], 0  ;;  %s750_s24 = smov 0   ;;  %s752_s25 = smov 0  }
   0x2   :  { %s754_s26 = smov 0   ;;  %s756_s27 = smov 0  }
   0x3 LB: > { %s771_s28 = sadd.s32 4294967295, %s705_s27   ;;  %s542_s29 = sadd.s32 4294967294, %s705_s27   ;;  %s705_s27 = sphi %s756_s27, %s902_s27   ;;  %s701_s26 = sphi %s754_s26, %s901_s26   ;;  %s697_s25 = sphi %s752_s25, %s900_s25   ;;  %s693_s24 = sphi %s750_s24, %s899_s24  }
   0x4   : > { %s775_s30 = sadd.s32 1, %s705_s27   ;;  %s179_s8 = sadd.s32 1, %s701_s26 }
   0x5   : > { %s176_s9 = ssub.s32 %s705_s27, %s775_s30  ;;  %p189_p0 = scmp.ne.s32.totalorder %s701_s26, %s697_s25 }
   0x6   : > { %p177_p1 = scmp.eq.s32.totalorder %s176_s9, 0  ;;  %p190_p2 = scmp.eq.s32.totalorder %s771_s28, 1 }
   0x7   : > { %p195_p3 = scmp.ne.s32.totalorder %s697_s25, %s693_s24  ;;  %p196_p4 = scmp.eq.s32.totalorder %s542_s29, 1 }
   0x8   : > { %s786_s10 = scalar_select %p177_p1, %s701_s26, %s179_s8  }
   0x9   : > { %p788_p5 = por %p190_p2, %p189_p0  ;;  %p792_p6 = por %p196_p4, %p195_p3 }
   0xa   : > { %p545_p7 = scmp.ge.s32.totalorder %s705_s27, 1  ;;  %p239_p8 = scmp.lt.s32.totalorder %s705_s27, 3 }
   0xc   : > { %p240_p9 = pnand %p545_p7, %p239_p8 }
   0xd   : > { %p270_p10 = scmp.lt.s32.totalorder (!%p240_p9), %s771_s28, 1  ;;  %vm278_vm0 = vcmask (!%p240_p9), 261120   ;;  %v633_v7 = vld [vmem:[%s892_s3] sm:$0xff] (!%p240_p9)   ;;  %v707_v8 = vmov (!%p240_p9), 0.0   ;;  %v634_v9 = vld [vmem:[%s892_s3 + $0x8] sm:$0xff] (!%p240_p9)   ;;  %vm708_vm1 = vmmov (!%p240_p9), 0  }
   0xe   : > { %243 = sbr.rel (%p240_p9) target bundleno = 812 (0x32c), region = 48  ;;  %572 = vmatprep.subr.bf16.mxu0 (!%p240_p9), %v707_v8  ;;  %580 = vmatprep.subr.bf16.mxu1 (!%p240_p9), %v707_v8  ;;  %v548_v14 = vld [vmem:[%s890_s1] ss:$0 sm:$0xff] (!%p240_p9)  ;;  %v636_v21 = vld [vmem:[%s894_s5 + $0x8] sm:$0xff] (!%p240_p9)   ;;  %v637_v22 = vld [vmem:[%s894_s5 + $0x10] sm:$0xff] (!%p240_p9)   ;;  %vm423_vm2 = vcmask (!%p240_p9), 523264  }
   0xf   : > { %573 = vmatpush3.bf16.msra.mxu0 (!%p240_p9), %v633_v7  ;;  %576 = vmatprep.mubr.msk.bf16.mxu0 (!%p240_p9), %vm708_vm1, %v707_v8  ;;  %v549_v16 = vld [vmem:[%s891_s2] ss:$0 sm:$0xff] (!%p240_p9)  ;;  %v638_v23 = vld [vmem:[%s894_s5 + $0x18] sm:$0xff] (!%p240_p9)   ;;  %s267_s22 = sand.u32 (!%p240_p9), 1, %s697_s25   ;;  %s561_s9 = sshll.u32 (!%p240_p9), %s771_s28, 7 }
  0x10   : > { %574 = vmatprep.subr.bf16.mxu0 (!%p240_p9), %v707_v8  ;;  %588 = vmatprep.mubr.msk.bf16.mxu1 (!%p240_p9), %vm708_vm1, %v707_v8  ;;  %v635_v20 = vld [vmem:[%s894_s5] sm:$0xff] (!%p240_p9)   ;;  %s546_s23 = sshll.u32 (!%p240_p9), %s267_s22, 3  ;;  %s709_s19 = smov (!%p240_p9), [#allocation2]  }
  0x11   : > { %581 = vmatpush3.bf16.msra.mxu1 (!%p240_p9), %v635_v20  ;;  %v550_v24 = vld [vmem:[%s893_s4] ss:$0 sm:$0xff] (!%p240_p9)  ;;  %s647_s20 = sshll.u32 (!%p240_p9), %s709_s19, 4  ;;  %s648_s20 = int_to_ptr.vmem [resolvable:$false] %s647_s20 }
  0x12   : > { %582 = vmatprep.subr.bf16.mxu1 (!%p240_p9), %v707_v8  ;;  %v554_v40 = vld [vmem:[%s895_s6] ss:$0 sm:$0xff] (!%p240_p9)  ;;  %s649_s21 = scalar_lea.vmem (!%p240_p9), %s648_s20, 256 }
  0x13   : > { %575 = vmatpush3.bf16.msra.mxu0 (!%p240_p9), %v634_v9 }
  0x15   : > { %s271_s13 = scalar_select %p270_p10, %s771_s28, 1  ;;  %583 = vmatpush3.bf16.msra.mxu1 %v636_v21 }
  0x16   : > { %584 = vmatprep.subr.bf16.mxu1 %v707_v8  ;;  %s470_s28 = scalar_lea.sflag [#allocation3], %s267_s22 }
  0x17   : > { %s547_s14 = sshll.u32 %s271_s13, 3  ;;  %s269_s13 = scalar_lea.vmem [#allocation2], %s546_s23 }
  0x18   : > { %s273_s17 = scalar_lea.vmem %s889_s0, %s547_s14  ;;  %s483_s14 = sshll.u32 %s269_s13, 4  ;;  %s848_s14 = int_to_ptr.vmem [resolvable:$true] %s483_s14 }
  0x19   : > { %v803_v0 = vld [vmem:[%s273_s17] sm:$0xff]  ;;  %585 = vmatpush3.bf16.msra.mxu1 %v637_v22  ;;  %s846_s17 = scalar_lea.hbm %s896_s7, %s561_s9  ;;  %s643_s18 = scalar_lea.vmem %s848_s14, 128 }
  0x1a   : > { %v279_v1 = vsel %vm278_vm0, %v803_v0, 0.0  ;;  %586 = vmatprep.subr.bf16.mxu1 %v707_v8  ;;  %p644_p11 = scmp.ne.s32.totalorder %s848_s14, %s643_s18  ;;  %p650_p0 = scmp.lt.s32.totalorder %s848_s14, %s648_s20 }
  0x1b   : > { %280 = vadd.xlane.f32.xlu0 %v279_v1  ;;  %p651_p1 = scmp.lt.s32.totalorder %s649_s21, %s643_s18 }
  0x1c   : > { %p645_p12 = pnand %p644_p11, %p788_p5 }
  0x1d   : > { %587 = vmatpush3.bf16.msra.mxu1 %v638_v23  ;;  %p652_p2 = por %p651_p1, %p650_p0 }
  0x1e   : > { %p646_p13 = pneg %p645_p12 }
  0x20   : > { %p653_p3 = pnand %p652_p2, %p646_p13 }
  0xa8   : > { %v281_v2 = vpop.xlane.xlu0 %280 }
  0xa9   : > { %v283_v3 = vmul.f32 0.03125, %v281_v2 }
  0xab   : > { %v284_v4 = vsub.f32 %v803_v0, %v283_v3 }
  0xad   : > { %v285_v5 = vmul.f32 %v284_v4, %v284_v4 }
  0xaf   : > { %v286_v6 = vsel %vm278_vm0, %v285_v5, 0.0 }
  0xb0   : > { %287 = vadd.xlane.f32.xlu0 %v286_v6 }
 0x13d   : > { %v288_v10 = vpop.xlane.xlu0 %287 }
 0x13e   : > { %v289_v11 = vmul.f32 0.03125, %v288_v10 }
 0x140   : > { %v290_v12 = vadd.f32 1e-05, %v289_v11 }
 0x142   : > { %639 = vrsqrt.f32 %v290_v12 }
 0x14c   : > { %v640_v13 = vpop.eup %639 }
 0x14d   : > { %v292_v15 = vmul.f32 %v640_v13, %v284_v4 }
 0x14f   : > { %v299_v17 = vmul.f32 %v548_v14, %v292_v15 }
 0x151   : > { %v306_v18 = vadd.f32 %v549_v16, %v299_v17 }
 0x153   : > { %v312_v19 = vpack.c.bf16 %v306_v18, %v306_v18 }
 0x155   : > { %577 = vmatmul.mubr.msk.bf16.vlgmr.msra.gmra.mrb[0].mxu0 %vm278_vm0, %v312_v19 }
 0x228   : > { %v368_v25 = vpop.f32.mrb[0].mxu0 }
 0x229   : > { %v369_v26 = vadd.f32 %v550_v24, %v368_v25  ;;  %v578_v27 = vpop.f32.mrb[1].mxu0 }
 0x22a   : > { %v371_v28 = vpop.f32.mrb[2].mxu0 }
 0x22b   : > { %v375_v29 = vmul.f32 0.044715, %v369_v26  ;;  %v579_v30 = vpop.f32.mrb[3].mxu0  ;;  %v374_v36 = vmul.f32 0.5, %v369_v26 }
 0x22d   : > { %v376_v31 = vmul.f32 %v375_v29, %v369_v26 }
 0x22f   : > { %v377_v32 = vmul.f32 %v376_v31, %v369_v26 }
 0x231   : > { %v378_v33 = vadd.f32 %v377_v32, %v369_v26 }
 0x233   : > { %v379_v34 = vmul.f32 0.7978846, %v378_v33 }
 0x235   : > { %641 = vtanh.f32 %v379_v34 }
 0x23f   : > { %v642_v35 = vpop.eup %641 }
 0x240   : > { %v381_v37 = vadd.f32 1.0, %v642_v35 }
 0x242   : > { %v382_v38 = vmul.f32 %v381_v37, %v374_v36 }
 0x244   : > { %v392_v39 = vpack.c.bf16 %v382_v38, %v382_v38 }
 0x246   : > { %589 = vmatmul.mubr.msk.bf16.vlgmr.msra.gmra.mrb[0].mxu1 %vm423_vm2, %v392_v39 }
 0x319   : > { %v461_v41 = vpop.f32.mrb[0].mxu1 }
 0x31a   : > { %v462_v42 = vadd.f32 %v554_v40, %v461_v41  ;;  %v590_v43 = vpop.f32.mrb[1].mxu1 }
 0x31b   : > { %v464_v44 = vpop.f32.mrb[2].mxu1 }
 0x31c   : > { %v467_v45 = vadd.f32 %v462_v42, %v803_v0  ;;  %v591_v46 = vpop.f32.mrb[3].mxu1 }
 0x31e   : > { %468 = vst.msk [vmem:[%s269_s13] sm:$0xff] %vm278_vm0, %v467_v45 }
 0x31f   : > { %656 = shalt.err (!%p653_p3)
}
 0x320   : > { %s657_s22 = scalar_lea.hbm %s846_s17, 128  ;;  %s661_s8 = scalar_lea.hbm %s896_s7, 256 }
 0x321   : > { %p658_p4 = scmp.ne.s32.totalorder %s846_s17, %s657_s22  ;;  %p662_p9 = scmp.lt.u32.totalorder %s846_s17, %s896_s7 }
 0x322   : > { %p663_p10 = scmp.lt.u32.totalorder %s661_s8, %s657_s22  ;;  %p665_p12 = scmp.lt.u32.totalorder %s657_s22, %s846_s17 }
 0x323   : > { %p659_p7 = pnand %p658_p4, %p788_p5 }
 0x324   : > { %p664_p11 = por %p663_p10, %p662_p9 }
 0x325   : > { %p660_p8 = pneg %p659_p7 }
 0x326   : > { %p666_p13 = por %p665_p12, %p664_p11 }
 0x328   : > { %p667_p0 = pnand %p666_p13, %p660_p8 }
 0x32a   : > { %670 = shalt.err (!%p667_p0)
}
 0x32b   : > { %592 = dma.vmem_to_hbm [thread:$0]  (%p788_p5), %s848_s14, 128, %s846_s17, %s470_s28  }
 0x32c PF: > { %p598_p1 = scmp.ge.s32.totalorder %s705_s27, 2  ;;  %s495_s15 = sand.u32 1, %s693_s24  }
 0x32d   : > { %s496_s16 = scalar_lea.sflag [#allocation3], %s495_s15 }
 0x32e   : > { %p595_p2 = pnand %p598_p1, %p792_p6 }
 0x330   : > { %688 = dma.done.wait (!%p595_p2), %s496_s16, 128  }
 0x331   : > { %690 = vsyncadd (!%p595_p2), %s496_s16, 4294967168  ;;  %p17_p3 = scmp.ge.s32.totalorder %s775_s30, 4   ;;  %s899_s24 = smov %s697_s25 }
 0x332   : > { %s900_s25 = smov %s701_s26  ;;  %s901_s26 = smov %s786_s10 }
 0x333   : > { %s902_s27 = smov %s775_s30  ;;  %19 = sbr.rel (!%p17_p3) target bundleno = 3 (0x3), region = 83 }
 0x33a   :  { %501 = vsyncpa [#allocation3], 1 }
 0x33b   :  { %503 = vsyncpa [#allocation3 + $0x1], 1 }

// kernel: attention_layer.4
= control target key start
LH: loop header
LB: loop body
LE: loop exit
PB: predicated region body
PF: predicated region fallthrough
CT: control target
= control target key end

     0   :  { %s2522_s21 = smov 0   ;;  %s2524_s22 = smov 0   ;;  %s2909_s0 = inlined_call_operand.vmem [shape: f32[8,2,1,32], index: 0, kind: input, shape index: {}]   ;;  %s2910_s1 = inlined_call_operand.vmem [shape: bf16[2,8,8,4], index: 1, kind: input, shape index: {}]   ;;  %s2911_s2 = inlined_call_operand.vmem [shape: bf16[2,8,8,4], index: 2, kind: input, shape index: {}]   ;;  %s2912_s3 = inlined_call_operand.vmem [shape: bf16[2,8,8,4], index: 3, kind: input, shape index: {}]   ;;  %s2913_s4 = inlined_call_operand.vmem [shape: bf16[8,4,32], index: 4, kind: input, shape index: {}]   ;;  %s2914_s5 = inlined_call_operand.vmem [shape: f32[1,32], index: 5, kind: input, shape index: {}]   ;;  %s2915_s6 = inlined_call_operand.vmem [shape: f32[8,2,1,32], index: 6, kind: output, shape index: {}]  }
   0x1   :  { %s2526_s23 = smov 0   ;;  %s2528_s24 = smov 0  }
   0x2   :  { %s2530_s25 = smov 0  }
   0x3 LB: > { %s28_s26 = sadd.s32 1, %s2478_s24  ;;  %s2096_s27 = sadd.s32 4294967295, %s2482_s25   ;;  %s2482_s25 = sphi %s2530_s25, %s16_s25   ;;  %s2478_s24 = sphi %s2528_s24, %s2920_s24   ;;  %s2474_s23 = sphi %s2526_s23, %s2919_s23   ;;  %s2470_s22 = sphi %s2524_s22, %s2918_s22   ;;  %s2466_s21 = sphi %s2522_s21, %s2917_s21  }
   0x4   : > { %p30_p0 = scmp.ge.s32.totalorder %s28_s26, 2  ;;  %p42_p1 = scmp.ne.s32.totalorder %s2470_s22, %s2466_s21 }
   0x5   : > { %p43_p2 = scmp.eq.s32.totalorder %s2482_s25, 0  ;;  %p203_p4 = scmp.eq.s32.totalorder %s2096_s27, 1 }
   0x6   : > { %s2922_s26 = smov (%p30_p0, %s28_s26), 0  ;;  %s35_s29 = sadd.s32 1, %s2470_s22 }
   0x7   : > { %p44_p3 = por %p43_p2, %p42_p1  ;;  %s32_s28 = ssub.s32 %s2478_s24, %s2922_s26 }
   0x8   : > { %p33_p5 = scmp.eq.s32.totalorder %s32_s28, 0  ;;  %p2557_p6 = por %p203_p4, %p42_p1 }
   0x9   : > { %p2100_p7 = scmp.ge.s32.totalorder %s2482_s25, 2 }
   0xa   : > { %s2562_s7 = scalar_select %p33_p5, %s2470_s22, %s35_s29  }
   0xb   : > { %237 = sbr.rel (%p2100_p7) target bundleno = 26 (0x1a), region = 24 }
  0x12   : > { %240 = sbr.rel (!%p44_p3) target bundleno = 26 (0x1a), region = 28  ;;  %s242_s8 = sand.u32 (%p44_p3), 1, %s2470_s22  }
  0x13   : > { %s245_s11 = scalar_lea.vmem (%p44_p3), %s2909_s0, %s2478_s24  ;;  %s2101_s12 = sshll.u32 (%p44_p3), %s242_s8, 3 }
  0x14   : > { %v261_v0 = vld [vmem:[%s245_s11] sm:$0x1] (%p44_p3)  ;;  %v263_v1 = vld [vmem:[%s245_s11 + $0x2] sm:$0x1] (%p44_p3)  ;;  %v265_v2 = vld [vmem:[%s245_s11 + $0x4] sm:$0x1] (%p44_p3) }
  0x15   : > { %v267_v3 = vld [vmem:[%s245_s11 + $0x6] sm:$0x1] (%p44_p3)  ;;  %s244_s13 = scalar_lea.vmem (%p44_p3), [#allocation2], %s2101_s12  ;;  %v269_v4 = vld [vmem:[%s245_s11 + $0x8] sm:$0x1] (%p44_p3) }
  0x16   : > { %262 = vst [vmem:[%s244_s13] sm:$0x1] (%p44_p3), %v261_v0  ;;  %264 = vst [vmem:[%s244_s13 + $0x1] sm:$0x1] (%p44_p3), %v263_v1  ;;  %v271_v5 = vld [vmem:[%s245_s11 + $0xa] sm:$0x1] (%p44_p3) }
  0x17   : > { %266 = vst [vmem:[%s244_s13 + $0x2] sm:$0x1] (%p44_p3), %v265_v2  ;;  %268 = vst [vmem:[%s244_s13 + $0x3] sm:$0x1] (%p44_p3), %v267_v3  ;;  %v273_v6 = vld [vmem:[%s245_s11 + $0xc] sm:$0x1] (%p44_p3) }
  0x18   : > { %270 = vst [vmem:[%s244_s13 + $0x4] sm:$0x1] (%p44_p3), %v269_v4  ;;  %272 = vst [vmem:[%s244_s13 + $0x5] sm:$0x1] (%p44_p3), %v271_v5  ;;  %v275_v7 = vld [vmem:[%s245_s11 + $0xe] sm:$0x1] (%p44_p3) }
  0x19   : > { %274 = vst [vmem:[%s244_s13 + $0x6] sm:$0x1] %v273_v6  ;;  %276 = vst [vmem:[%s244_s13 + $0x7] sm:$0x1] %v275_v7 }
  0x1a PF: > { %p2102_p8 = scmp.ge.s32.totalorder %s2482_s25, 1  ;;  %p353_p9 = scmp.lt.s32.totalorder %s2482_s25, 3 }
  0x1c   : > { %p354_p10 = pnand %p2102_p8, %p353_p9 }
  0x1d   : > { %p421_p11 = scmp.lt.s32.totalorder (!%p354_p10), %s2474_s23, 1  ;;  %v2484_v8 = vmov (!%p354_p10), 0.0   ;;  %vm2485_vm0 = vmmov (!%p354_p10), 0   ;;  %vm481_vm1 = vcmask (!%p354_p10), 31744   ;;  %vm850_vm2 = vcmask (!%p354_p10), 64512   ;;  %s360_s9 = sand.u32 (!%p354_p10), 1, %s2466_s21  }
  0x1e   : > { %357 = sbr.rel (%p354_p10) target bundleno = 963 (0x3c3), region = 81  ;;  %2197 = vmatprep.subr.bf16.mxu1 (!%p354_p10), %v2484_v8  ;;  %2199 = vmatprep.mubr.msk.bf16.mxu1 (!%p354_p10), %vm2485_vm0, %v2484_v8  ;;  %vm934_vm3 = vcmask (!%p354_p10), 1043456   ;;  %vm1330_vm4 = vcmask (!%p354_p10), 1041408   ;;  %s2817_s10 = sshll.u32 (!%p354_p10), %s360_s9, 3  ;;  %vm1797_vm5 = vcmask (!%p354_p10), 253952  }
  0x1f   : > { %2245 = vmatprep.subr.bf16.mxu0 (!%p354_p10), %v2484_v8  ;;  %2247 = vmatprep.mubr.msk.bf16.mxu0 (!%p354_p10), %vm2485_vm0, %v2484_v8  ;;  %s362_s21 = scalar_lea.vmem (!%p354_p10), [#allocation2], %s2817_s10  ;;  %s2832_s13 = scalar_lea.vmem (!%p354_p10), [#allocation3], %s2817_s10 }
  0x25   : > { %s422_s14 = scalar_select %p421_p11, %s2474_s23, 1 }
  0x26   : > { %s1896_s16 = scalar_lea.vmem (%p2557_p6), %s2915_s6, %s2474_s23 }
  0x27   : > { %s2580_s15 = sshll.u32 %s422_s14, 5 }
  0x28   : > { %s2586_s18 = scalar_lea.vmem %s2911_s2, %s2580_s15  ;;  %s2594_s27 = scalar_lea.vmem %s2910_s1, %s2580_s15 }
  0x29   : > { %v465_v9 = vld [vmem:[%s2586_s18] sm:$0xf]  ;;  %v466_v11 = vld [vmem:[%s2586_s18 + $0x4] sm:$0xf]  ;;  %v467_v14 = vld [vmem:[%s2586_s18 + $0x8] sm:$0xf]  ;;  %s2674_s8 = scalar_lea.vmem %s2912_s3, %s2580_s15 }
  0x2a   : > { %v486_v10 = vsel %vm481_vm1, %v465_v9, 0  ;;  %v457_v12 = vld [vmem:[%s2594_s27] sm:$0xf]  ;;  %v532_v13 = vsel %vm481_vm1, %v466_v11, 0  ;;  %v458_v15 = vld [vmem:[%s2594_s27 + $0x4] sm:$0xf] }
  0x2b   : > { %2198 = vmatpush3.bf16.xpose.msra.mxu1 %v486_v10  ;;  %v578_v16 = vsel %vm481_vm1, %v467_v14, 0  ;;  %v468_v17 = vld [vmem:[%s2586_s18 + $0xc] sm:$0xf]  ;;  %v459_v18 = vld [vmem:[%s2594_s27 + $0x8] sm:$0xf] }
  0x2c   : > { %2203 = vmatprep.subr.bf16.mxu1 %v2484_v8  ;;  %v624_v19 = vsel %vm481_vm1, %v468_v17, 0  ;;  %v469_v20 = vld [vmem:[%s2586_s18 + $0x10] sm:$0xf]  ;;  %v460_v21 = vld [vmem:[%s2594_s27 + $0xc] sm:$0xf] }
  0x2d   : > { %v670_v22 = vsel %vm481_vm1, %v469_v20, 0  ;;  %v470_v23 = vld [vmem:[%s2586_s18 + $0x14] sm:$0xf]  ;;  %v461_v24 = vld [vmem:[%s2594_s27 + $0x10] sm:$0xf] }
  0x2e   : > { %v716_v25 = vsel %vm481_vm1, %v470_v23, 0  ;;  %v471_v26 = vld [vmem:[%s2586_s18 + $0x18] sm:$0xf]  ;;  %v462_v27 = vld [vmem:[%s2594_s27 + $0x14] sm:$0xf] }
  0x2f   : > { %v762_v28 = vsel %vm481_vm1, %v471_v26, 0  ;;  %v472_v29 = vld [vmem:[%s2586_s18 + $0x1c] sm:$0xf]  ;;  %v463_v30 = vld [vmem:[%s2594_s27 + $0x18] sm:$0xf] }
  0x30   : > { %v808_v31 = vsel %vm481_vm1, %v472_v29, 0  ;;  %v464_v32 = vld [vmem:[%s2594_s27 + $0x1c] sm:$0xf]  ;;  %v474_v58 = vld [vmem:[%s2674_s8 + $0x4] sm:$0xf] }
  0x31   : > { %v982_v59 = vsel %vm934_vm3, %v474_v58, 0  ;;  %v473_v61 = vld [vmem:[%s2674_s8] sm:$0xf]  ;;  %v475_v4 = vld [vmem:[%s2674_s8 + $0x8] sm:$0xf] }
  0x32   : > { %2200 = vmatmul.mubr.msk.bf16.vlgmr.msra.gmra.mrb[0].mxu1 %vm481_vm1, %v457_v12  ;;  %v936_v0 = vsel %vm934_vm3, %v473_v61, 0  ;;  %v1028_v7 = vsel %vm934_vm3, %v475_v4, 0  ;;  %v476_v11 = vld [vmem:[%s2674_s8 + $0xc] sm:$0xf]  ;;  %v478_v20 = vld [vmem:[%s2674_s8 + $0x14] sm:$0xf] }
  0x33   : > { %2204 = vmatpush3.bf16.xpose.msra.mxu1 %v532_v13  ;;  %2205 = vmatprep.mubr.msk.bf16.mxu1 %vm2485_vm0, %v2484_v8  ;;  %v1074_v12 = vsel %vm934_vm3, %v476_v11, 0  ;;  %v2127_v11 = vld [vmem:[%s2913_s4 + $0x2] sm:$0x3] }
  0x34   : > { %2209 = vmatprep.subr.bf16.mxu1 %v2484_v8  ;;  %2246 = vmatpush3.bf16.msra.mxu0 %v936_v0 }
  0x35   : > { %2257 = vmatprep.subr.bf16.mxu0 %v2484_v8 }
  0x3a   : > { %2206 = vmatmul.mubr.msk.bf16.vlgmr.msra.gmra.mrb[4].mxu1 %vm481_vm1, %v458_v15 }
  0x3b   : > { %2210 = vmatpush3.bf16.xpose.msra.mxu1 %v578_v16  ;;  %2211 = vmatprep.mubr.msk.bf16.mxu1 %vm2485_vm0, %v2484_v8 }
  0x3c   : > { %2215 = vmatprep.subr.bf16.mxu1 %v2484_v8 }
  0x42   : > { %2212 = vmatmul.mubr.msk.bf16.vlgmr.msra.gmra.mrb[8].mxu1 %vm481_vm1, %v459_v18  ;;  %v477_v18 = vld [vmem:[%s2674_s8 + $0x10] sm:$0xf] }
  0x43   : > { %2216 = vmatpush3.bf16.xpose.msra.mxu1 %v624_v19  ;;  %2217 = vmatprep.mubr.msk.bf16.mxu1 %vm2485_vm0, %v2484_v8  ;;  %v1120_v19 = vsel %vm934_vm3, %v477_v18, 0 }
  0x44   : > { %2221 = vmatprep.subr.bf16.mxu1 %v2484_v8 }
  0x4a   : > { %2218 = vmatmul.mubr.msk.bf16.vlgmr.msra.gmra.mrb[12].mxu1 %vm481_vm1, %v460_v21  ;;  %v1166_v21 = vsel %vm934_vm3, %v478_v20, 0 }
  0x4b   : > { %2222 = vmatpush3.bf16.xpose.msra.mxu1 %v670_v22  ;;  %2223 = vmatprep.mubr.msk.bf16.mxu1 %vm2485_vm0, %v2484_v8  ;;  %v479_v22 = vld [vmem:[%s2674_s8 + $0x18] sm:$0xf] }
  0x4c   : > { %2227 = vmatprep.subr.bf16.mxu1 %v2484_v8  ;;  %v2704_v23 = vsel %vm934_vm3, %v479_v22, 0 }
  0x52   : > { %2224 = vmatmul.mubr.msk.bf16.vlgmr.msra.gmra.mrb[16].mxu1 %vm481_vm1, %v461_v24  ;;  %v480_v24 = vld [vmem:[%s2674_s8 + $0x1c] sm:$0xf] }
  0x53   : > { %2228 = vmatpush3.bf16.xpose.msra.mxu1 %v716_v25  ;;  %2229 = vmatprep.mubr.msk.bf16.mxu1 %vm2485_vm0, %v2484_v8  ;;  %v2708_v25 = vsel %vm934_vm3, %v480_v24, 0 }
  0x54   : > { %2233 = vmatprep.subr.bf16.mxu1 %v2484_v8 }
  0x5a   : > { %2230 = vmatmul.mubr.msk.bf16.vlgmr.msra.gmra.mrb[20].mxu1 %vm481_vm1, %v462_v27 }
  0x5b   : > { %2234 = vmatpush3.bf16.xpose.msra.mxu1 %v762_v28  ;;  %2235 = vmatprep.mubr.msk.bf16.mxu1 %vm2485_vm0, %v2484_v8 }
  0x5c   : > { %2239 = vmatprep.subr.bf16.mxu1 %v2484_v8 }
  0x62   : > { %2236 = vmatmul.mubr.msk.bf16.vlgmr.msra.gmra.mrb[24].mxu1 %vm481_vm1, %v463_v30 }
  0x63   : > { %2240 = vmatpush3.bf16.xpose.msra.mxu1 %v808_v31  ;;  %2241 = vmatprep.mubr.msk.bf16.mxu1 %vm2485_vm0, %v2484_v8 }
  0x64   : > { %2251 = vmatprep.subr.bf16.mxu1 %v2484_v8 }
  0x6a   : > { %2242 = vmatmul.mubr.msk.bf16.vlgmr.msra.gmra.mrb[28].mxu1 %vm481_vm1, %v464_v32 }
  0x6b   : > { %2253 = vmatprep.mubr.msk.bf16.mxu1 %vm2485_vm0, %v2484_v8  ;;  %2252 = vmatpush3.bf16.msra.mxu1 %v982_v59 }
  0x6c   : > { %2263 = vmatprep.subr.bf16.mxu1 %v2484_v8 }
 0x105   : > { %v2650_v33 = vpop.f32.mrb[0].mxu1 }
 0x106   : > { %v2201_v34 = vpop.f32.mrb[1].mxu1  ;;  %v851_v42 = vsel %vm850_vm2, %v2650_v33, -inf }
 0x107   : > { %v525_v35 = vpop.f32.mrb[2].mxu1 }
 0x108   : > { %v2202_v36 = vpop.f32.mrb[3].mxu1 }
 0x10d   : > { %v2652_v37 = vpop.f32.mrb[4].mxu1 }
 0x10e   : > { %v2207_v38 = vpop.f32.mrb[5].mxu1  ;;  %v854_v39 = vsel %vm850_vm2, %v2652_v37, -inf }
 0x10f   : > { %855 = vmax.xlane.f32.xlu0 %v854_v39  ;;  %v571_v40 = vpop.f32.mrb[6].mxu1 }
 0x110   : > { %v2208_v41 = vpop.f32.mrb[7].mxu1 }
 0x113   : > { %852 = vmax.xlane.f32.xlu0 %v851_v42 }
 0x115   : > { %v2658_v43 = vpop.f32.mrb[8].mxu1 }
 0x116   : > { %v857_v44 = vsel %vm850_vm2, %v2658_v43, -inf  ;;  %v2213_v45 = vpop.f32.mrb[9].mxu1 }
 0x117   : > { %858 = vmax.xlane.f32.xlu1 %v857_v44  ;;  %v617_v46 = vpop.f32.mrb[10].mxu1 }
 0x118   : > { %v2214_v47 = vpop.f32.mrb[11].mxu1 }
 0x11d   : > { %v2662_v48 = vpop.f32.mrb[12].mxu1 }
 0x11e   : > { %v860_v49 = vsel %vm850_vm2, %v2662_v48, -inf  ;;  %v2219_v50 = vpop.f32.mrb[13].mxu1 }
 0x11f   : > { %861 = vmax.xlane.f32.xlu1 %v860_v49  ;;  %v663_v51 = vpop.f32.mrb[14].mxu1 }
 0x120   : > { %v2220_v52 = vpop.f32.mrb[15].mxu1 }
 0x125   : > { %v2666_v53 = vpop.f32.mrb[16].mxu1 }
 0x126   : > { %v863_v54 = vsel %vm850_vm2, %v2666_v53, -inf  ;;  %v2225_v55 = vpop.f32.mrb[17].mxu1 }
 0x127   : > { %864 = vmax.xlane.f32.xlu0 %v863_v54  ;;  %v709_v56 = vpop.f32.mrb[18].mxu1 }
 0x128   : > { %v2226_v57 = vpop.f32.mrb[19].mxu1 }
 0x12d   : > { %v2679_v60 = vpop.f32.mrb[20].mxu1 }
 0x12e   : > { %v866_v62 = vsel %vm850_vm2, %v2679_v60, -inf  ;;  %v2231_v63 = vpop.f32.mrb[21].mxu1 }
 0x12f   : > { %867 = vmax.xlane.f32.xlu1 %v866_v62  ;;  %v755_v1 = vpop.f32.mrb[22].mxu1 }
 0x130   : > { %v2232_v2 = vpop.f32.mrb[23].mxu1 }
 0x135   : > { %v2686_v3 = vpop.f32.mrb[24].mxu1 }
 0x136   : > { %v869_v5 = vsel %vm850_vm2, %v2686_v3, -inf  ;;  %v2237_v6 = vpop.f32.mrb[25].mxu1 }
 0x137   : > { %870 = vmax.xlane.f32.xlu0 %v869_v5  ;;  %v801_v9 = vpop.f32.mrb[26].mxu1 }
 0x138   : > { %v2238_v10 = vpop.f32.mrb[27].mxu1 }
 0x13d   : > { %v2694_v13 = vpop.f32.mrb[28].mxu1 }
 0x13e   : > { %v872_v14 = vsel %vm850_vm2, %v2694_v13, -inf  ;;  %v2243_v15 = vpop.f32.mrb[29].mxu1 }
 0x13f   : > { %873 = vmax.xlane.f32.xlu1 %v872_v14  ;;  %v847_v16 = vpop.f32.mrb[30].mxu1 }
 0x140   : > { %v2244_v17 = vpop.f32.mrb[31].mxu1 }
 0x141   : > { %v1324_v17 = vld [vmem:[%s2913_s4] sm:$0x3] }
 0x19c   : > { %v856_v26 = vpop.xlane.xlu0 %855 }
 0x19d   : > { %v876_v27 = vsub.f32 %v2652_v37, %v856_v26 }
 0x19f   : > { %v885_v28 = vmul.f32 1.442695, %v876_v27 }
 0x1a0   : > { %v853_v29 = vpop.xlane.xlu0 %852 }
 0x1a1   : > { %2412 = vpow2.f32 %v885_v28  ;;  %v875_v30 = vsub.f32 %v2650_v33, %v853_v29 }
 0x1a3   : > { %v883_v31 = vmul.f32 1.442695, %v875_v30 }
 0x1a4   : > { %v859_v32 = vpop.xlane.xlu1 %858 }
 0x1a5   : > { %2414 = vpow2.f32 %v883_v31  ;;  %v877_v34 = vsub.f32 %v2658_v43, %v859_v32  ;;  %v2130_v32 = vld [vmem:[%s2913_s4 + $0x4] sm:$0x3] }
 0x1a7   : > { %v887_v35 = vmul.f32 1.442695, %v877_v34 }
 0x1a9   : > { %2416 = vpow2.f32 %v887_v35 }
 0x1ab   : > { %v2413_v36 = vpop.eup %2412 }
 0x1ac   : > { %v862_v38 = vpop.xlane.xlu1 %861  ;;  %v902_v39 = vsel %vm850_vm2, %v2413_v36, 0.0  ;;  %v924_v40 = vpack.c.bf16 %v2413_v36, %v2413_v36 }
 0x1ad   : > { %v878_v41 = vsub.f32 %v2662_v48, %v862_v38  ;;  %903 = vadd.xlane.f32.xlu0 %v902_v39  ;;  %v1426_v39 = vsel %vm1330_vm4, %v2130_v32, 0 }
 0x1ae   : > { %2254 = vmatmul.mubr.msk.bf16.vlgmr.msra.gmra.mrb[32].mxu1 %vm850_vm2, %v924_v40 }
 0x1af   : > { %v2415_v37 = vpop.eup %2414  ;;  %v889_v42 = vmul.f32 1.442695, %v878_v41  ;;  %2264 = vmatpush3.bf16.msra.mxu1 %v1074_v12  ;;  %2265 = vmatprep.mubr.msk.bf16.mxu1 %vm2485_vm0, %v2484_v8  ;;  %v1332_v12 = vsel %vm1330_vm4, %v2127_v11, 0 }
 0x1b0   : > { %v899_v33 = vsel %vm850_vm2, %v2415_v37, 0.0  ;;  %v923_v43 = vpack.c.bf16 %v2415_v37, %v2415_v37  ;;  %2275 = vmatprep.subr.bf16.mxu1 %v2484_v8 }
 0x1b1   : > { %2418 = vpow2.f32 %v889_v42  ;;  %900 = vadd.xlane.f32.xlu1 %v899_v33 }
 0x1b2   : > { %2248 = vmatmul.mubr.msk.bf16.vlgmr.msra.gmra.mrb[0].mxu0 %vm850_vm2, %v923_v43 }
 0x1b3   : > { %v2417_v44 = vpop.eup %2416  ;;  %2258 = vmatpush3.bf16.msra.mxu0 %v1028_v7  ;;  %2259 = vmatprep.mubr.msk.bf16.mxu0 %vm2485_vm0, %v2484_v8 }
 0x1b4   : > { %v865_v45 = vpop.xlane.xlu0 %864  ;;  %v905_v46 = vsel %vm850_vm2, %v2417_v44, 0.0  ;;  %2269 = vmatprep.subr.bf16.mxu0 %v2484_v8  ;;  %v925_v49 = vpack.c.bf16 %v2417_v44, %v2417_v44 }
 0x1b5   : > { %v879_v47 = vsub.f32 %v2666_v53, %v865_v45  ;;  %906 = vadd.xlane.f32.xlu0 %v905_v46  ;;  %v2132_v46 = vld [vmem:[%s2913_s4 + $0x6] sm:$0x3] }
 0x1b7   : > { %v891_v48 = vmul.f32 1.442695, %v879_v47 }
 0x1b9   : > { %2420 = vpow2.f32 %v891_v48 }
 0x1ba   : > { %2260 = vmatmul.mubr.msk.bf16.vlgmr.msra.gmra.mrb[4].mxu0 %vm850_vm2, %v925_v49 }
 0x1bb   : > { %v2419_v50 = vpop.eup %2418  ;;  %2270 = vmatpush3.bf16.msra.mxu0 %v1120_v19  ;;  %2271 = vmatprep.mubr.msk.bf16.mxu0 %vm2485_vm0, %v2484_v8 }
 0x1bc   : > { %v868_v51 = vpop.xlane.xlu1 %867  ;;  %v908_v52 = vsel %vm850_vm2, %v2419_v50, 0.0  ;;  %v926_v54 = vpack.c.bf16 %v2419_v50, %v2419_v50  ;;  %2281 = vmatprep.subr.bf16.mxu0 %v2484_v8 }
 0x1bd   : > { %v880_v55 = vsub.f32 %v2679_v60, %v868_v51  ;;  %909 = vadd.xlane.f32.xlu1 %v908_v52  ;;  %v1475_v51 = vsel %vm1330_vm4, %v2132_v46, 0  ;;  %v1722_v46 = vld [vmem:[%s362_s21 + $0x4] sm:$0x1] }
 0x1be   : > { %2266 = vmatmul.mubr.msk.bf16.vlgmr.msra.gmra.mrb[36].mxu1 %vm850_vm2, %v926_v54 }
 0x1bf   : > { %v893_v53 = vmul.f32 1.442695, %v880_v55  ;;  %2276 = vmatpush3.bf16.msra.mxu1 %v1166_v21  ;;  %2277 = vmatprep.mubr.msk.bf16.mxu1 %vm2485_vm0, %v2484_v8 }
 0x1c0   : > { %2287 = vmatprep.subr.bf16.mxu1 %v2484_v8 }
 0x1c1   : > { %2422 = vpow2.f32 %v893_v53 }
 0x1c3   : > { %v2421_v56 = vpop.eup %2420 }
 0x1c4   : > { %v871_v57 = vpop.xlane.xlu0 %870  ;;  %v911_v58 = vsel %vm850_vm2, %v2421_v56, 0.0  ;;  %v927_v59 = vpack.c.bf16 %v2421_v56, %v2421_v56 }
 0x1c5   : > { %v881_v61 = vsub.f32 %v2686_v3, %v871_v57  ;;  %912 = vadd.xlane.f32.xlu0 %v911_v58 }
 0x1c6   : > { %2272 = vmatmul.mubr.msk.bf16.vlgmr.msra.gmra.mrb[8].mxu0 %vm850_vm2, %v927_v59  ;;  %v2134_v59 = vld [vmem:[%s2913_s4 + $0x8] sm:$0x3] }
 0x1c7   : > { %v895_v60 = vmul.f32 1.442695, %v881_v61  ;;  %2282 = vmatpush3.bf16.msra.mxu0 %v2704_v23  ;;  %2283 = vmatprep.mubr.msk.bf16.mxu0 %vm2485_vm0, %v2484_v8  ;;  %v1378_v23 = vsel %vm1330_vm4, %v1324_v17, 0 }
 0x1c8   : > { %2293 = vmatprep.subr.bf16.mxu0 %v2484_v8 }
 0x1c9   : > { %2424 = vpow2.f32 %v895_v60  ;;  %v1524_v60 = vsel %vm1330_vm4, %v2134_v59, 0 }
 0x1cb   : > { %v2423_v62 = vpop.eup %2422 }
 0x1cc   : > { %v874_v63 = vpop.xlane.xlu1 %873  ;;  %v914_v0 = vsel %vm850_vm2, %v2423_v62, 0.0  ;;  %v928_v1 = vpack.c.bf16 %v2423_v62, %v2423_v62 }
 0x1cd   : > { %v882_v2 = vsub.f32 %v2694_v13, %v874_v63  ;;  %915 = vadd.xlane.f32.xlu1 %v914_v0 }
 0x1ce   : > { %2278 = vmatmul.mubr.msk.bf16.vlgmr.msra.gmra.mrb[40].mxu1 %vm850_vm2, %v928_v1 }
 0x1cf   : > { %v897_v3 = vmul.f32 1.442695, %v882_v2  ;;  %2288 = vmatpush3.bf16.msra.mxu1 %v2708_v25  ;;  %2289 = vmatprep.mubr.msk.bf16.mxu1 %vm2485_vm0, %v2484_v8 }
 0x1d1   : > { %2426 = vpow2.f32 %v897_v3 }
 0x1d3   : > { %v2425_v4 = vpop.eup %2424 }
 0x1d4   : > { %v917_v5 = vsel %vm850_vm2, %v2425_v4, 0.0  ;;  %v929_v6 = vpack.c.bf16 %v2425_v4, %v2425_v4 }
 0x1d5   : > { %918 = vadd.xlane.f32.xlu0 %v917_v5 }
 0x1d6   : > { %2284 = vmatmul.mubr.msk.bf16.vlgmr.msra.gmra.mrb[12].mxu0 %vm850_vm2, %v929_v6  ;;  %v2136_v6 = vld [vmem:[%s2913_s4 + $0xa] sm:$0x3] }
 0x1d7   : > { %2295 = vmatprep.mubr.msk.bf16.mxu0 %vm2485_vm0, %v2484_v8  ;;  %2294 = vmatpush3.bf16.msra.mxu0 %v1332_v12  ;;  %v1573_v12 = vsel %vm1330_vm4, %v2136_v6, 0 }
 0x1d8   : > { %2299 = vmatprep.subr.bf16.mxu0 %v2484_v8 }
 0x1db   : > { %v2427_v7 = vpop.eup %2426 }
 0x1dc   : > { %v920_v9 = vsel %vm850_vm2, %v2427_v7, 0.0  ;;  %v930_v10 = vpack.c.bf16 %v2427_v7, %v2427_v7 }
 0x1dd   : > { %921 = vadd.xlane.f32.xlu1 %v920_v9 }
 0x1de   : > { %2290 = vmatmul.mubr.msk.bf16.vlgmr.msra.gmra.mrb[44].mxu1 %vm850_vm2, %v930_v10 }
 0x23a   : > { %v904_v13 = vpop.xlane.xlu0 %903 }
 0x23b   : > { %2428 = vrcp.f32 %v904_v13 }
 0x23e   : > { %v901_v14 = vpop.xlane.xlu1 %900 }
 0x23f   : > { %2430 = vrcp.f32 %v901_v14 }
 0x242   : > { %v907_v28 = vpop.xlane.xlu0 %906 }
 0x243   : > { %2432 = vrcp.f32 %v907_v28  ;;  %v2486_v28 = vmov 1966171168  }
 0x245   : > { %v2429_v15 = vpop.eup %2428 }
 0x249   : > { %v2431_v29 = vpop.eup %2430 }
 0x24a   : > { %v910_v33 = vpop.xlane.xlu1 %909 }
 0x24b   : > { %2434 = vrcp.f32 %v910_v33 }
 0x24d   : > { %v2433_v43 = vpop.eup %2432 }
 0x252   : > { %v913_v54 = vpop.xlane.xlu0 %912 }
 0x253   : > { %2436 = vrcp.f32 %v913_v54  ;;  %v1723_v54 = vld [vmem:[%s362_s21 + $0x5] sm:$0x1] }
 0x255   : > { %v2435_v53 = vpop.eup %2434 }
 0x25a   : > { %v916_v2 = vpop.xlane.xlu1 %915 }
 0x25b   : > { %2438 = vrcp.f32 %v916_v2 }
 0x25d   : > { %v2437_v3 = vpop.eup %2436 }
 0x262   : > { %v919_v13 = vpop.xlane.xlu0 %918 }
 0x263   : > { %2440 = vrcp.f32 %v919_v13 }
 0x265   : > { %v2439_v14 = vpop.eup %2438 }
 0x281   : > { %v1018_v16 = vpop.f32.mrb[32].mxu1 }
 0x282   : > { %v1309_v18 = vmul.f32 %v2429_v15, %v1018_v16  ;;  %v2255_v19 = vpop.f32.mrb[33].mxu1  ;;  %v2138_v16 = vld [vmem:[%s2913_s4 + $0xc] sm:$0x3] }
 0x283   : > { %v1021_v20 = vpop.f32.mrb[34].mxu1  ;;  %v922_v19 = vpop.xlane.xlu1 %921 }
 0x284   : > { %v1317_v21 = vpack.c.bf16 %v1309_v18, %v1309_v18  ;;  %v2256_v22 = vpop.f32.mrb[35].mxu1  ;;  %v1622_v18 = vsel %vm1330_vm4, %v2138_v16, 0  ;;  %v2441_v20 = vpop.eup %2440  ;;  %2442 = vrcp.f32 %v922_v19 }
 0x285   : > { %v972_v24 = vpop.f32.mrb[0].mxu0  ;;  %v2140_v22 = vld [vmem:[%s2913_s4 + $0xe] sm:$0x3] }
 0x286   : > { %v2249_v25 = vpop.f32.mrb[1].mxu0  ;;  %2296 = vmatmul.mubr.msk.bf16.vlgmr.msra.gmra.mrb[16].mxu0 %vm481_vm1, %v1317_v21  ;;  %v1308_v30 = vmul.f32 %v2431_v29, %v972_v24  ;;  %v1671_v24 = vsel %vm1330_vm4, %v2140_v22, 0  ;;  %v1734_v29 = vunpack.c.l.s4 %v2486_v28 }
 0x287   : > { %v975_v26 = vpop.f32.mrb[2].mxu0  ;;  %2300 = vmatpush3.bf16.msra.mxu0 %v1378_v23  ;;  %2301 = vmatprep.mubr.msk.bf16.mxu0 %vm2485_vm0, %v2484_v8 }
 0x288   : > { %v2250_v27 = vpop.f32.mrb[3].mxu0  ;;  %2305 = vmatprep.subr.bf16.mxu0 %v2484_v8  ;;  %v1316_v36 = vpack.c.bf16 %v1308_v30, %v1308_v30  ;;  %v1736_v30 = vlaneseq }
 0x28a   : > { %v1737_v32 = vshrl.u32 %v1736_v30, 7 }
 0x28d   : > { %v1064_v31 = vpop.f32.mrb[4].mxu0 }
 0x28e   : > { %v2261_v34 = vpop.f32.mrb[5].mxu0  ;;  %v1310_v44 = vmul.f32 %v2433_v43, %v1064_v31  ;;  %v2443_v25 = vpop.eup %2442  ;;  %v1735_v31 = vunpack.c.0.s8 %v1734_v29 }
 0x28f   : > { %v1067_v35 = vpop.f32.mrb[6].mxu0 }
 0x290   : > { %v2262_v38 = vpop.f32.mrb[7].mxu0  ;;  %v1318_v49 = vpack.c.bf16 %v1310_v44, %v1310_v44  ;;  %v2819_v34 = vsub.s32 %v1735_v31, %v1737_v32  ;;  %v1719_v44 = vld [vmem:[%s362_s21 + $0x1] sm:$0x1] }
 0x291   : > { %v1110_v40 = vpop.f32.mrb[36].mxu1 }
 0x292   : > { %v2267_v41 = vpop.f32.mrb[37].mxu1  ;;  %2302 = vmatmul.mubr.msk.bf16.vlgmr.msra.gmra.mrb[16].mxu0 %vm481_vm1, %v1316_v36  ;;  %v1311_v57 = vmul.f32 %v2435_v53, %v1110_v40 }
 0x293   : > { %v1113_v37 = vpop.f32.mrb[38].mxu1  ;;  %2306 = vmatpush3.bf16.msra.mxu0 %v1426_v39  ;;  %2307 = vmatprep.mubr.msk.bf16.mxu0 %vm2485_vm0, %v2484_v8  ;;  %v1718_v41 = vld [vmem:[%s362_s21] sm:$0x1] }
 0x294   : > { %v2268_v42 = vpop.f32.mrb[39].mxu1  ;;  %2311 = vmatprep.subr.bf16.mxu0 %v2484_v8  ;;  %v1319_v61 = vpack.c.bf16 %v1311_v57, %v1311_v57 }
 0x299   : > { %v1156_v45 = vpop.f32.mrb[8].mxu0 }
 0x29a   : > { %v2273_v47 = vpop.f32.mrb[9].mxu0  ;;  %v1312_v4 = vmul.f32 %v2437_v3, %v1156_v45  ;;  %v1720_v45 = vld [vmem:[%s362_s21 + $0x2] sm:$0x1] }
 0x29b   : > { %v1159_v48 = vpop.f32.mrb[10].mxu0 }
 0x29c   : > { %v2274_v50 = vpop.f32.mrb[11].mxu0  ;;  %v1320_v10 = vpack.c.bf16 %v1312_v4, %v1312_v4 }
 0x29e   : > { %2308 = vmatmul.mubr.msk.bf16.vlgmr.msra.gmra.mrb[16].mxu0 %vm481_vm1, %v1318_v49 }
 0x29f   : > { %2312 = vmatpush3.bf16.msra.mxu0 %v1475_v51  ;;  %2313 = vmatprep.mubr.msk.bf16.mxu0 %vm2485_vm0, %v2484_v8 }
 0x2a0   : > { %2317 = vmatprep.subr.bf16.mxu0 %v2484_v8 }
 0x2a1   : > { %v1202_v52 = vpop.f32.mrb[40].mxu1 }
 0x2a2   : > { %v2279_v55 = vpop.f32.mrb[41].mxu1  ;;  %v1313_v15 = vmul.f32 %v2439_v14, %v1202_v52  ;;  %v1721_v52 = vld [vmem:[%s362_s21 + $0x3] sm:$0x1] }
 0x2a3   : > { %v1205_v56 = vpop.f32.mrb[42].mxu1  ;;  %v1724_v55 = vld [vmem:[%s362_s21 + $0x6] sm:$0x1] }
 0x2a4   : > { %v2280_v58 = vpop.f32.mrb[43].mxu1  ;;  %v1321_v17 = vpack.c.bf16 %v1313_v15, %v1313_v15 }
 0x2a9   : > { %v1248_v62 = vpop.f32.mrb[12].mxu0 }
 0x2aa   : > { %v2285_v63 = vpop.f32.mrb[13].mxu0  ;;  %2314 = vmatmul.mubr.msk.bf16.vlgmr.msra.gmra.mrb[16].mxu0 %vm481_vm1, %v1319_v61  ;;  %v1314_v21 = vmul.f32 %v2441_v20, %v1248_v62 }
 0x2ab   : > { %v1251_v0 = vpop.f32.mrb[14].mxu0  ;;  %2318 = vmatpush3.bf16.msra.mxu0 %v1524_v60  ;;  %2319 = vmatprep.mubr.msk.bf16.mxu0 %vm2485_vm0, %v2484_v8  ;;  %v1725_v60 = vld [vmem:[%s362_s21 + $0x7] sm:$0x1] }
 0x2ac   : > { %v2286_v1 = vpop.f32.mrb[15].mxu0  ;;  %2323 = vmatprep.subr.bf16.mxu0 %v2484_v8  ;;  %v1322_v23 = vpack.c.bf16 %v1314_v21, %v1314_v21 }
 0x2b1   : > { %v1294_v5 = vpop.f32.mrb[44].mxu1 }
 0x2b2   : > { %v2291_v7 = vpop.f32.mrb[45].mxu1  ;;  %v1315_v26 = vmul.f32 %v2443_v25, %v1294_v5 }
 0x2b3   : > { %v1297_v9 = vpop.f32.mrb[46].mxu1 }
 0x2b4   : > { %v2292_v11 = vpop.f32.mrb[47].mxu1  ;;  %v1323_v27 = vpack.c.bf16 %v1315_v26, %v1315_v26 }
 0x2b6   : > { %2320 = vmatmul.mubr.msk.bf16.vlgmr.msra.gmra.mrb[16].mxu0 %vm481_vm1, %v1320_v10 }
 0x2b7   : > { %2324 = vmatpush3.bf16.msra.mxu0 %v1573_v12  ;;  %2325 = vmatprep.mubr.msk.bf16.mxu0 %vm2485_vm0, %v2484_v8 }
 0x2b8   : > { %2329 = vmatprep.subr.bf16.mxu0 %v2484_v8 }
 0x2c2   : > { %2326 = vmatmul.mubr.msk.bf16.vlgmr.msra.gmra.mrb[16].mxu0 %vm481_vm1, %v1321_v17 }
 0x2c3   : > { %2330 = vmatpush3.bf16.msra.mxu0 %v1622_v18  ;;  %2331 = vmatprep.mubr.msk.bf16.mxu0 %vm2485_vm0, %v2484_v8 }
 0x2c4   : > { %2335 = vmatprep.subr.bf16.mxu0 %v2484_v8 }
 0x2ce   : > { %2332 = vmatmul.mubr.msk.bf16.vlgmr.msra.gmra.mrb[16].mxu0 %vm481_vm1, %v1322_v23 }
 0x2cf   : > { %2336 = vmatpush3.bf16.msra.mxu0 %v1671_v24  ;;  %2337 = vmatprep.mubr.msk.bf16.mxu0 %vm2485_vm0, %v2484_v8  ;;  %v2142_v8 = vld [vmem:[%s2914_s5] ss:$0 sm:$0xff] }
 0x2d0   : > { %v1732_v35 = vcombine.high %v2142_v8, %v2142_v8  ;;  %v1739_v36 = vrot.slane %v2142_v8, %v2819_v34 }
 0x2d2   : > { %v1746_v38 = vrot.slane %v1732_v35, %v2819_v34  ;;  %v1747_v39 = vcombine.high %v1739_v36, %v1739_v36  ;;  %v1755_v40 = vrot.slane %v1739_v36, %v2819_v34 }
 0x2d4   : > { %v1748_v37 = vcombine.high %v1746_v38, %v1746_v38  ;;  %v1762_v42 = vrot.slane %v1746_v38, %v2819_v34  ;;  %v1769_v33 = vrot.slane %v1747_v39, %v2819_v34  ;;  %v1777_v43 = vcombine.high %v1755_v40, %v1755_v40 }
 0x2d5   : > { %v1789_v47 = vadd.f32 %v1755_v40, %v1718_v41 }
 0x2d6   : > { %v1776_v48 = vrot.slane %v1748_v37, %v2819_v34  ;;  %v1778_v49 = vcombine.high %v1762_v42, %v1762_v42  ;;  %v1779_v50 = vcombine.high %v1769_v33, %v1769_v33  ;;  %v1790_v51 = vadd.f32 %v1769_v33, %v1719_v44 }
 0x2d7   : > { %v1791_v53 = vadd.f32 %v1777_v43, %v1720_v45  ;;  %v1793_v56 = vadd.f32 %v1762_v42, %v1722_v46  ;;  %1798 = vst.msk [vmem:[%s2832_s13] sm:$0x1] %vm1797_vm5, %v1789_v47 }
 0x2d8   : > { %v1780_v57 = vcombine.high %v1776_v48, %v1776_v48  ;;  %v1792_v58 = vadd.f32 %v1779_v50, %v1721_v52  ;;  %v1794_v59 = vadd.f32 %v1776_v48, %v1723_v54  ;;  %v1795_v61 = vadd.f32 %v1778_v49, %v1724_v55  ;;  %1799 = vst.msk [vmem:[%s2832_s13 + $0x1] sm:$0x1] %vm1797_vm5, %v1790_v51 }
 0x2d9   : > { %1800 = vst.msk [vmem:[%s2832_s13 + $0x2] sm:$0x1] %vm1797_vm5, %v1791_v53  ;;  %1802 = vst.msk [vmem:[%s2832_s13 + $0x4] sm:$0x1] %vm1797_vm5, %v1793_v56 }
 0x2da   : > { %2338 = vmatmul.mubr.msk.bf16.vlgmr.msra.gmra.mrb[16].mxu0 %vm481_vm1, %v1323_v27  ;;  %v1796_v62 = vadd.f32 %v1780_v57, %v1725_v60  ;;  %1801 = vst.msk [vmem:[%s2832_s13 + $0x3] sm:$0x1] %vm1797_vm5, %v1792_v58  ;;  %1803 = vst.msk [vmem:[%s2832_s13 + $0x5] sm:$0x1] %vm1797_vm5, %v1794_v59 }
 0x2db   : > { %1804 = vst.msk [vmem:[%s2832_s13 + $0x6] sm:$0x1] %vm1797_vm5, %v1795_v61 }
 0x2dc   : > { %1805 = vst.msk [vmem:[%s2832_s13 + $0x7] sm:$0x1] %vm1797_vm5, %v1796_v62 }
 0x2de   : > { %v1806_v4 = vld [vmem:[%s2832_s13] sm:$0x1] }
 0x2df   : > { %v1807_v10 = vld [vmem:[%s2832_s13 + $0x1] sm:$0x1] }
 0x2e0   : > { %v1808_v11 = vld [vmem:[%s2832_s13 + $0x2] sm:$0x1]  ;;  %v1810_v12 = vld [vmem:[%s2832_s13 + $0x4] sm:$0x1] }
 0x2e1   : > { %v1809_v17 = vld [vmem:[%s2832_s13 + $0x3] sm:$0x1]  ;;  %v1811_v18 = vld [vmem:[%s2832_s13 + $0x5] sm:$0x1] }
 0x2e2   : > { %v1812_v19 = vld [vmem:[%s2832_s13 + $0x6] sm:$0x1] }
 0x2e3   : > { %v1813_v25 = vld [vmem:[%s2832_s13 + $0x7] sm:$0x1] }
 0x3ad   : > { %v1707_v63 = vpop.f32.mrb[16].mxu0 }
 0x3ae   : > { %v1815_v0 = vcombine.high %v1707_v63, %v1707_v63  ;;  %v1822_v1 = vrot.slane %v1707_v63, %v2819_v34  ;;  %v2339_v2 = vpop.f32.mrb[17].mxu0 }
 0x3af   : > { %v1710_v3 = vpop.f32.mrb[18].mxu0 }
 0x3b0   : > { %v1829_v5 = vrot.slane %v1815_v0, %v2819_v34  ;;  %v1830_v6 = vcombine.high %v1822_v1, %v1822_v1  ;;  %v1838_v7 = vrot.slane %v1822_v1, %v2819_v34  ;;  %v2340_v9 = vpop.f32.mrb[19].mxu0 }
 0x3b2   : > { %v1831_v13 = vcombine.high %v1829_v5, %v1829_v5  ;;  %v1845_v14 = vrot.slane %v1829_v5, %v2819_v34  ;;  %v1852_v15 = vrot.slane %v1830_v6, %v2819_v34  ;;  %v1860_v16 = vcombine.high %v1838_v7, %v1838_v7 }
 0x3b3   : > { %v1872_v20 = vadd.f32 %v1838_v7, %v1806_v4 }
 0x3b4   : > { %v1859_v21 = vrot.slane %v1831_v13, %v2819_v34  ;;  %v1861_v22 = vcombine.high %v1845_v14, %v1845_v14  ;;  %v1862_v23 = vcombine.high %v1852_v15, %v1852_v15  ;;  %v1873_v24 = vadd.f32 %v1852_v15, %v1807_v10  ;;  %1895 = sbr.rel (!%p2557_p6) target bundleno = 963 (0x3c3), region = 93 }
 0x3b5   : > { %v1874_v26 = vadd.f32 %v1860_v16, %v1808_v11  ;;  %v1876_v27 = vadd.f32 %v1845_v14, %v1810_v12  ;;  %1881 = vst.msk [vmem:[%s2832_s13] sm:$0x1] %vm1797_vm5, %v1872_v20 }
 0x3b6   : > { %v1863_v28 = vcombine.high %v1859_v21, %v1859_v21  ;;  %v1875_v29 = vadd.f32 %v1862_v23, %v1809_v17  ;;  %v1877_v30 = vadd.f32 %v1859_v21, %v1811_v18  ;;  %v1878_v31 = vadd.f32 %v1861_v22, %v1812_v19  ;;  %1882 = vst.msk [vmem:[%s2832_s13 + $0x1] sm:$0x1] %vm1797_vm5, %v1873_v24 }
 0x3b7   : > { %1883 = vst.msk [vmem:[%s2832_s13 + $0x2] sm:$0x1] %vm1797_vm5, %v1874_v26  ;;  %1885 = vst.msk [vmem:[%s2832_s13 + $0x4] sm:$0x1] %vm1797_vm5, %v1876_v27 }
 0x3b8   : > { %v1879_v32 = vadd.f32 %v1863_v28, %v1813_v25  ;;  %1884 = vst.msk [vmem:[%s2832_s13 + $0x3] sm:$0x1] %vm1797_vm5, %v1875_v29  ;;  %1886 = vst.msk [vmem:[%s2832_s13 + $0x5] sm:$0x1] %vm1797_vm5, %v1877_v30 }
 0x3b9   : > { %1887 = vst.msk [vmem:[%s2832_s13 + $0x6] sm:$0x1] %vm1797_vm5, %v1878_v31 }
 0x3ba   : > { %1888 = vst.msk [vmem:[%s2832_s13 + $0x7] sm:$0x1] %vm1797_vm5, %v1879_v32 }
 0x3bc   : > { %v1912_v34 = vld [vmem:[%s2832_s13] sm:$0x1] }
 0x3bd   : > { %v1914_v8 = vld [vmem:[%s2832_s13 + $0x1] sm:$0x1]  ;;  %1913 = vst [vmem:[%s1896_s16] sm:$0x1] %v1912_v34 }
 0x3be   : > { %v1916_v35 = vld [vmem:[%s2832_s13 + $0x2] sm:$0x1]  ;;  %1915 = vst [vmem:[%s1896_s16 + $0x2] sm:$0x1] %v1914_v8  ;;  %v1920_v38 = vld [vmem:[%s2832_s13 + $0x4] sm:$0x1] }
 0x3bf   : > { %1917 = vst [vmem:[%s1896_s16 + $0x4] sm:$0x1] %v1916_v35  ;;  %v1918_v36 = vld [vmem:[%s2832_s13 + $0x3] sm:$0x1]  ;;  %v1922_v39 = vld [vmem:[%s2832_s13 + $0x5] sm:$0x1] }
 0x3c0   : > { %1919 = vst [vmem:[%s1896_s16 + $0x6] sm:$0x1] %v1918_v36  ;;  %1921 = vst [vmem:[%s1896_s16 + $0x8] sm:$0x1] %v1920_v38  ;;  %v1924_v40 = vld [vmem:[%s2832_s13 + $0x6] sm:$0x1] }
 0x3c1   : > { %1923 = vst [vmem:[%s1896_s16 + $0xa] sm:$0x1] %v1922_v39  ;;  %v1926_v41 = vld [vmem:[%s2832_s13 + $0x7] sm:$0x1]  ;;  %1925 = vst [vmem:[%s1896_s16 + $0xc] sm:$0x1] %v1924_v40 }
 0x3c2   : > { %1927 = vst [vmem:[%s1896_s16 + $0xe] sm:$0x1] %v1926_v41 }
 0x3c3 PF: > { %s16_s25 = sadd.s32 1, %s2482_s25   ;;  %s2917_s21 = smov %s2470_s22 }
 0x3c4   : > { %p13_p12 = scmp.ge.s32.totalorder %s16_s25, 4   ;;  %s2918_s22 = smov %s2562_s7 }
 0x3c5   : > { %s2919_s23 = smov %s2478_s24  ;;  %s2920_s24 = smov %s2922_s26 }
 0x3c6   :  { %15 = sbr.rel (!%p13_p12) target bundleno = 3 (0x3), region = 184 }

</bundles_post_ra>
